<compile_context>
chip_gen: v6e
topology: v6e:2x2x1
jax: 0.10.0
libtpu: 0.0.40
codegen_flags: <defaults>
</compile_context>

<pallas_src>
import functools

import jax
import jax.numpy as jnp
from jax import lax
from jax.experimental import pallas as pl

D_MODEL = 32
NHEAD = 4
DIM_FF = 64
HEAD_DIM = D_MODEL // NHEAD
EPS = 1e-5           # nn.LayerNorm default
NEG_INF = -1e30

# --------------------------------------------------------------------------
# static layout of the packed (rows, 32) parameter slab (see prepare_params)
# --------------------------------------------------------------------------
_OFF_M_SA = 0                          # (H*D, D)  merged Q.K^T weights, self-attn
_OFF_N_SA = NHEAD * D_MODEL            # (H*D, D)  merged V.Wo weights,  self-attn
_OFF_M_CA = 2 * NHEAD * D_MODEL        # (H*D, D)  merged Q.K^T weights, cross-attn
_OFF_N_CA = 3 * NHEAD * D_MODEL        # (H*D, D)  merged V.Wo weights,  cross-attn
_OFF_W2 = 4 * NHEAD * D_MODEL          # (FF, D)   linear2 weight (in, out)
_OFF_CONST = _OFF_W2 + DIM_FF          # 16 rows of (1, D) constants (9 used)
_N_CONST_ROWS = 16
_OFF_C_SA = _OFF_CONST + _N_CONST_ROWS  # (H*T*B, D) query-bias correction, self-attn
# cross-attn correction rows follow at _OFF_C_SA + H*T*B (runtime-shape dependent)

# constant-row indices inside the 16-row block
_ROW_OB_SA, _ROW_OB_CA, _ROW_B2 = 0, 1, 2
_ROW_N1G, _ROW_N1B, _ROW_N2G, _ROW_N2B, _ROW_N3G, _ROW_N3B = 3, 4, 5, 6, 7, 8


# ---------------------------------------------------------------------------
# in-kernel helpers (traced into the Pallas body)
# ---------------------------------------------------------------------------
def _layer_norm(x, g, b):
    mu = jnp.mean(x, axis=-1, keepdims=True)
    xc = x - mu
    var = jnp.mean(xc * xc, axis=-1, keepdims=True)
    return xc * lax.rsqrt(var + EPS) * g + b


def _merged_attention(xq, xk, xv, m_stk, n_stk, c_corr, add_mask, out_bias, *, nq):
    """Multi-head attention with pre-merged weights, no lane relayouts.

    xq/xk/xv: (nq, D)/(nk, D)/(nk, D) token-major, batch-minor rows.
    m_stk/n_stk: (H*D, D) sublane-stacked merged weights
                 (M_h = Wq_h Wk_h^T / sqrt(hd), N_h = Wv_h Wo_h).
    c_corr:   (H*nq, D) query-bias correction rows (bq_h Wk_h^T / sqrt(hd)).
    add_mask: (H*nq, H*nk) additive 0 / -1e30 same-head & same-batch mask.
    out_bias: (1, D) precomputed bv @ Wo + bo.
    """
    f32 = jnp.float32
    D, H = D_MODEL, NHEAD

    # per-head "query" rows: A_h = xq @ M_h, stacked along sublanes (cheap)
    a_s = jnp.concatenate(
        [jnp.dot(xq, m_stk[h * D:(h + 1) * D, :], preferred_element_type=f32)
         for h in range(H)], axis=0) + c_corr                       # (H*nq, D)

    # per-head value rows already projected through Wo: Y_h = xv @ N_h
    y_s = jnp.concatenate(
        [jnp.dot(xv, n_stk[h * D:(h + 1) * D, :], preferred_element_type=f32)
         for h in range(H)], axis=0)                                # (H*nk, D)

    # keys replicated per head along the sublane axis (vreg-aligned copies)
    xk_rep = jnp.concatenate([xk] * H, axis=0)                      # (H*nk, D)

    # one score matmul (32-deep contraction) + constant block-diagonal mask
    s = lax.dot_general(a_s, xk_rep, (((1,), (1,)), ((), ())),
                        preferred_element_type=f32) + add_mask      # (H*nq, H*nk)

    # softmax over keys (masked entries underflow to exactly 0)
    s = s - jnp.max(s, axis=-1, keepdims=True)
    p = jnp.exp(s)
    p = p * pl.reciprocal(jnp.sum(p, axis=-1, keepdims=True), approx=True)

    z = jnp.dot(p, y_s, preferred_element_type=f32)                 # (H*nq, D)

    # output projection = sum of per-head row blocks + folded constant bias
    out = out_bias
    for h in range(H):
        out = out + z[h * nq:(h + 1) * nq, :]
    return out                                                      # (nq, D)


# ---------------------------------------------------------------------------
# Pallas kernel: the whole decoder layer, whole batch, one invocation
# ---------------------------------------------------------------------------
def decoder_layer_kernel(tgt_ref, mem_ref, qpos_ref, pos_ref,
                         slab32_ref, ffn_ref, mask_sa_ref, mask_ca_ref,
                         out_ref, *, tb):
    f32 = jnp.float32
    D, H, FF = D_MODEL, NHEAD, DIM_FF
    hq = H * tb
    off_c_ca = _OFF_C_SA + hq

    # (1, D) constant rows (out-proj biases, b2, LayerNorm gammas/betas)
    cst = slab32_ref[_OFF_CONST:_OFF_CONST + _N_CONST_ROWS, :]      # (16, D)
    crow = lambda i: cst[i:i + 1, :]

    tgt = tgt_ref[...]        # (T*B, D)
    mem = mem_ref[...]        # (S*B, D)
    qpos = qpos_ref[...]      # (T*B, D)
    pos = pos_ref[...]        # (S*B, D)

    # ---- self attention: q = k = tgt + query_pos, value = tgt ----
    x = tgt + qpos
    sa = _merged_attention(
        x, x, tgt,
        slab32_ref[_OFF_M_SA:_OFF_M_SA + H * D, :],
        slab32_ref[_OFF_N_SA:_OFF_N_SA + H * D, :],
        slab32_ref[_OFF_C_SA:_OFF_C_SA + hq, :],
        mask_sa_ref[...], crow(_ROW_OB_SA), nq=tb)
    tgt = _layer_norm(tgt + sa, crow(_ROW_N1G), crow(_ROW_N1B))     # dropout1 = id

    # ---- cross attention: q = tgt + query_pos, k = memory + pos, v = memory ----
    ca = _merged_attention(
        tgt + qpos, mem + pos, mem,
        slab32_ref[_OFF_M_CA:_OFF_M_CA + H * D, :],
        slab32_ref[_OFF_N_CA:_OFF_N_CA + H * D, :],
        slab32_ref[off_c_ca:off_c_ca + hq, :],
        mask_ca_ref[...], crow(_ROW_OB_CA), nq=tb)
    tgt = _layer_norm(tgt + ca, crow(_ROW_N2G), crow(_ROW_N2B))     # dropout2 = id

    # ---- feed forward (relu, dropout = identity) ----
    w1 = ffn_ref[0:D, :]                                            # (D, FF)
    b1 = ffn_ref[D:D + 1, :]                                        # (1, FF)
    h1 = jnp.maximum(jnp.dot(tgt, w1, preferred_element_type=f32) + b1, 0.0)
    w2 = slab32_ref[_OFF_W2:_OFF_W2 + FF, :]                        # (FF, D)
    ff = jnp.dot(h1, w2, preferred_element_type=f32) + crow(_ROW_B2)
    out_ref[...] = _layer_norm(tgt + ff, crow(_ROW_N3G), crow(_ROW_N3B))  # dropout3 = id


# ---------------------------------------------------------------------------
# parameters (PyTorch shapes), one-time packing, and the jitted wrapper
# ---------------------------------------------------------------------------
def init_params(key):
    """Deterministic synthetic parameters with the nn.Module's shapes."""
    ks = jax.random.split(key, 10)
    f32 = jnp.float32
    D, FF = D_MODEL, DIM_FF
    return {
        # self_attn (nn.MultiheadAttention)
        "sa_in_w": 0.05 * jax.random.normal(ks[0], (3 * D, D), f32),
        "sa_in_b": 0.01 * jax.random.normal(ks[1], (3 * D,), f32),
        "sa_out_w": 0.05 * jax.random.normal(ks[2], (D, D), f32),
        "sa_out_b": jnp.zeros((D,), f32),
        # multihead_attn (cross attention)
        "ca_in_w": 0.05 * jax.random.normal(ks[3], (3 * D, D), f32),
        "ca_in_b": 0.01 * jax.random.normal(ks[4], (3 * D,), f32),
        "ca_out_w": 0.05 * jax.random.normal(ks[5], (D, D), f32),
        "ca_out_b": jnp.zeros((D,), f32),
        # FFN
        "l1_w": 0.05 * jax.random.normal(ks[6], (FF, D), f32),
        "l1_b": 0.01 * jax.random.normal(ks[7], (FF,), f32),
        "l2_w": 0.05 * jax.random.normal(ks[8], (D, FF), f32),
        "l2_b": 0.01 * jax.random.normal(ks[9], (D,), f32),
        # LayerNorms
        "n1_g": jnp.ones((D,), f32), "n1_b": jnp.zeros((D,), f32),
        "n2_g": jnp.ones((D,), f32), "n2_b": jnp.zeros((D,), f32),
        "n3_g": jnp.ones((D,), f32), "n3_b": jnp.zeros((D,), f32),
    }


def prepare_params(params, T, S, B):
    """ONE-TIME host-side packing (not in the per-call jitted path).

    Returns (slab32, ffn64, mask_sa, mask_ca):
      slab32  (592 + 2*H*T*B, 32): sublane-stacked merged weights + constants
      ffn64   (33, 64):            linear1 weight (in,out) + its bias row
      mask_sa (H*T*B, H*T*B):      additive 0/-1e30 same-head & same-batch mask
      mask_ca (H*T*B, H*S*B):      same, for cross attention
    """
    D, H, hd, FF = D_MODEL, NHEAD, HEAD_DIM, DIM_FF
    f32 = jnp.float32
    scale = 1.0 / (hd ** 0.5)
    TB, SB = T * B, S * B

    def merge_attn(in_w, in_b, out_w, out_b, nq_rows):
        Wq, Wk, Wv = in_w[:D].T, in_w[D:2 * D].T, in_w[2 * D:].T    # (D, D) math orient.
        bq, bv = in_b[:D], in_b[2 * D:]
        Wo = out_w.T                                                # (D, D)
        m_blocks, n_blocks, c_rows = [], [], []
        for h in range(H):
            Wq_h = Wq[:, h * hd:(h + 1) * hd]
            Wk_h = Wk[:, h * hd:(h + 1) * hd]
            Wv_h = Wv[:, h * hd:(h + 1) * hd]
            Wo_h = Wo[h * hd:(h + 1) * hd, :]
            m_blocks.append((Wq_h @ Wk_h.T) * scale)                # (D, D)
            n_blocks.append(Wv_h @ Wo_h)                            # (D, D)
            c_rows.append((bq[h * hd:(h + 1) * hd] @ Wk_h.T) * scale)   # (D,)
        m_stk = jnp.concatenate(m_blocks, axis=0)                   # (H*D, D)
        n_stk = jnp.concatenate(n_blocks, axis=0)                   # (H*D, D)
        c_full = jnp.concatenate(
            [jnp.tile(c[None, :], (nq_rows, 1)) for c in c_rows], axis=0)  # (H*nq, D)
        out_bias = bv @ Wo + out_b                                  # (D,)
        return m_stk, n_stk, c_full, out_bias

    m_sa, n_sa, c_sa, ob_sa = merge_attn(params["sa_in_w"], params["sa_in_b"],
                                         params["sa_out_w"], params["sa_out_b"], TB)
    m_ca, n_ca, c_ca, ob_ca = merge_attn(params["ca_in_w"], params["ca_in_b"],
                                         params["ca_out_w"], params["ca_out_b"], TB)

    rows = jnp.stack([ob_sa, ob_ca, params["l2_b"],
                      params["n1_g"], params["n1_b"],
                      params["n2_g"], params["n2_b"],
                      params["n3_g"], params["n3_b"]], axis=0)
    const_rows = jnp.zeros((_N_CONST_ROWS, D), f32).at[:rows.shape[0]].set(rows)

    slab32 = jnp.concatenate(
        [m_sa, n_sa, m_ca, n_ca, params["l2_w"].T, const_rows, c_sa, c_ca],
        axis=0).astype(f32)                                         # (592 + 2*H*TB, D)

    ffn64 = jnp.concatenate(
        [params["l1_w"].T, params["l1_b"][None, :]], axis=0).astype(f32)   # (33, FF)

    def block_mask(nq_rows, nk_rows):
        rq = jnp.arange(H * nq_rows)
        ck = jnp.arange(H * nk_rows)
        ok = ((rq[:, None] // nq_rows) == (ck[None, :] // nk_rows)) & \
             ((rq[:, None] % B) == (ck[None, :] % B))
        return jnp.where(ok, 0.0, NEG_INF).astype(f32)

    mask_sa = block_mask(TB, TB)
    mask_ca = block_mask(TB, SB)
    return slab32, ffn64, mask_sa, mask_ca


@jax.jit
def transformer_decoder_layer(tgt, memory, query_pos, pos,
                              slab32, ffn64, mask_sa, mask_ca):
    """tgt/query_pos: (T, B, D); memory/pos: (S, B, D)  (PyTorch convention).

    slab32/ffn64/mask_sa/mask_ca come from prepare_params (computed once).
    """
    T, B, D = tgt.shape
    S = memory.shape[0]
    tb, sb = T * B, S * B

    # Row-major flatten is layout-free (no transpose / HBM round trip).
    out_f = pl.pallas_call(
        functools.partial(decoder_layer_kernel, tb=tb),
        out_shape=jax.ShapeDtypeStruct((tb, D), jnp.float32),
    )(tgt.reshape(tb, D), memory.reshape(sb, D),
      query_pos.reshape(tb, D), pos.reshape(sb, D),
      slab32, ffn64, mask_sa, mask_ca)

    return out_f.reshape(T, B, D)


# ---------------------------------------------------------------------------
# pure-JAX reference (mirrors the PyTorch module in eval mode, no masks)
# ---------------------------------------------------------------------------
def _ref_mha(q_in, k_in, v_in, in_w, in_b, out_w, out_b):
    D = q_in.shape[-1]
    H, hd = NHEAD, HEAD_DIM
    q = q_in @ in_w[:D].T + in_b[:D]
    k = k_in @ in_w[D:2 * D].T + in_b[D:2 * D]
    v = v_in @ in_w[2 * D:].T + in_b[2 * D:]

    def split(x):                      # (L, B, D) -> (B, H, L, hd)
        L, B, _ = x.shape
        return x.reshape(L, B, H, hd).transpose(1, 2, 0, 3)

    qh, kh, vh = split(q), split(k), split(v)
    s = jnp.einsum("bhld,bhmd->bhlm", qh, kh) / (hd ** 0.5)
    p = jax.nn.softmax(s, axis=-1)
    o = jnp.einsum("bhlm,bhmd->bhld", p, vh)
    o = o.transpose(2, 0, 1, 3).reshape(q_in.shape[0], q_in.shape[1], D)
    return o @ out_w.T + out_b


def _ref_decoder_layer(tgt, memory, query_pos, pos, p):
    def ln(x, g, b):
        mu = x.mean(-1, keepdims=True)
        var = ((x - mu) ** 2).mean(-1, keepdims=True)
        return (x - mu) / jnp.sqrt(var + EPS) * g + b

    x = tgt
    qk = x + query_pos
    sa = _ref_mha(qk, qk, x, p["sa_in_w"], p["sa_in_b"], p["sa_out_w"], p["sa_out_b"])
    x = ln(x + sa, p["n1_g"], p["n1_b"])
    ca = _ref_mha(x + query_pos, memory + pos, memory,
                  p["ca_in_w"], p["ca_in_b"], p["ca_out_w"], p["ca_out_b"])
    x = ln(x + ca, p["n2_g"], p["n2_b"])
    ff = jnp.maximum(x @ p["l1_w"].T + p["l1_b"], 0.0) @ p["l2_w"].T + p["l2_b"]
    x = ln(x + ff, p["n3_g"], p["n3_b"])
    return x


if __name__ == "__main__":
    key = jax.random.PRNGKey(0)
    k_tgt, k_mem, k_qp, k_pos, k_par = jax.random.split(key, 5)

    T, S, B = 8, 8, 2     # target seq len, memory seq len, batch
    tgt = jax.random.normal(k_tgt, (T, B, D_MODEL), jnp.float32)
    memory = jax.random.normal(k_mem, (S, B, D_MODEL), jnp.float32)
    query_pos = jax.random.normal(k_qp, (T, B, D_MODEL), jnp.float32)
    pos = jax.random.normal(k_pos, (S, B, D_MODEL), jnp.float32)
    params = init_params(k_par)

    # one-time packing (NOT in the per-call path)
    packed = prepare_params(params, T, S, B)

    out = transformer_decoder_layer(tgt, memory, query_pos, pos, *packed)
    jax.block_until_ready(out)

    assert out.shape == (T, B, D_MODEL)
    assert bool(jnp.all(jnp.isfinite(out)))

    ref = _ref_decoder_layer(tgt, memory, query_pos, pos, params)
    max_err = float(jnp.max(jnp.abs(out - ref)))
    assert max_err < 5e-2, f"max abs err vs reference: {max_err}"

    print("KERNEL_OK")
</pallas_src>

<mosaic_0001>
module attributes {stable_mosaic.version = 11 : i64} {
  func.func @decoder_layer_kernel(%arg0: memref<16x32xf32, #tpu.memory_space<vmem>>, %arg1: memref<16x32xf32, #tpu.memory_space<vmem>>, %arg2: memref<16x32xf32, #tpu.memory_space<vmem>>, %arg3: memref<16x32xf32, #tpu.memory_space<vmem>>, %arg4: memref<720x32xf32, #tpu.memory_space<vmem>>, %arg5: memref<33x64xf32, #tpu.memory_space<vmem>>, %arg6: memref<64x64xf32, #tpu.memory_space<vmem>>, %arg7: memref<64x64xf32, #tpu.memory_space<vmem>>, %arg8: memref<16x32xf32, #tpu.memory_space<vmem>>) attributes {dimension_semantics = [], scalar_prefetch = 0 : i64, scratch_operands = 0 : i64, tpu.core_type = #tpu.core_type<tc>} {
    %c576 = arith.constant 576 : index
    %c0 = arith.constant 0 : index
    %0 = vector.load %arg4[%c576, %c0] : memref<720x32xf32, #tpu.memory_space<vmem>>, vector<16x32xf32>
    %c0_0 = arith.constant 0 : index
    %c0_1 = arith.constant 0 : index
    %1 = vector.load %arg0[%c0_0, %c0_1] : memref<16x32xf32, #tpu.memory_space<vmem>>, vector<16x32xf32>
    %c0_2 = arith.constant 0 : index
    %c0_3 = arith.constant 0 : index
    %2 = vector.load %arg1[%c0_2, %c0_3] : memref<16x32xf32, #tpu.memory_space<vmem>>, vector<16x32xf32>
    %c0_4 = arith.constant 0 : index
    %c0_5 = arith.constant 0 : index
    %3 = vector.load %arg2[%c0_4, %c0_5] : memref<16x32xf32, #tpu.memory_space<vmem>>, vector<16x32xf32>
    %c0_6 = arith.constant 0 : index
    %c0_7 = arith.constant 0 : index
    %4 = vector.load %arg3[%c0_6, %c0_7] : memref<16x32xf32, #tpu.memory_space<vmem>>, vector<16x32xf32>
    %5 = arith.addf %1, %3 : vector<16x32xf32>
    %c0_8 = arith.constant 0 : index
    %c0_9 = arith.constant 0 : index
    %6 = vector.load %arg4[%c0_8, %c0_9] : memref<720x32xf32, #tpu.memory_space<vmem>>, vector<128x32xf32>
    %c128 = arith.constant 128 : index
    %c0_10 = arith.constant 0 : index
    %7 = vector.load %arg4[%c128, %c0_10] : memref<720x32xf32, #tpu.memory_space<vmem>>, vector<128x32xf32>
    %c592 = arith.constant 592 : index
    %c0_11 = arith.constant 0 : index
    %8 = vector.load %arg4[%c592, %c0_11] : memref<720x32xf32, #tpu.memory_space<vmem>>, vector<64x32xf32>
    %c0_12 = arith.constant 0 : index
    %c0_13 = arith.constant 0 : index
    %9 = vector.load %arg6[%c0_12, %c0_13] : memref<64x64xf32, #tpu.memory_space<vmem>>, vector<64x64xf32>
    %10 = vector.extract_strided_slice %0 {offsets = [0, 0], sizes = [1, 32], strides = [1, 1]} : vector<16x32xf32> to vector<1x32xf32>
    %11 = vector.extract_strided_slice %6 {offsets = [0, 0], sizes = [32, 32], strides = [1, 1]} : vector<128x32xf32> to vector<32x32xf32>
    %cst = arith.constant dense<0.000000e+00> : vector<16x32xf32>
    %12 = tpu.matmul %5, %11, %cst {dimension_numbers = #tpu.dot_dimension_numbers<[1], [0], [0], [1], [0, 0, 1, 1], [], []>} : vector<16x32xf32>, vector<32x32xf32>, vector<16x32xf32> -> vector<16x32xf32>
    %13 = vector.extract_strided_slice %6 {offsets = [32, 0], sizes = [32, 32], strides = [1, 1]} : vector<128x32xf32> to vector<32x32xf32>
    %cst_14 = arith.constant dense<0.000000e+00> : vector<16x32xf32>
    %14 = tpu.matmul %5, %13, %cst_14 {dimension_numbers = #tpu.dot_dimension_numbers<[1], [0], [0], [1], [0, 0, 1, 1], [], []>} : vector<16x32xf32>, vector<32x32xf32>, vector<16x32xf32> -> vector<16x32xf32>
    %15 = vector.extract_strided_slice %6 {offsets = [64, 0], sizes = [32, 32], strides = [1, 1]} : vector<128x32xf32> to vector<32x32xf32>
    %cst_15 = arith.constant dense<0.000000e+00> : vector<16x32xf32>
    %16 = tpu.matmul %5, %15, %cst_15 {dimension_numbers = #tpu.dot_dimension_numbers<[1], [0], [0], [1], [0, 0, 1, 1], [], []>} : vector<16x32xf32>, vector<32x32xf32>, vector<16x32xf32> -> vector<16x32xf32>
    %17 = vector.extract_strided_slice %6 {offsets = [96, 0], sizes = [32, 32], strides = [1, 1]} : vector<128x32xf32> to vector<32x32xf32>
    %cst_16 = arith.constant dense<0.000000e+00> : vector<16x32xf32>
    %18 = tpu.matmul %5, %17, %cst_16 {dimension_numbers = #tpu.dot_dimension_numbers<[1], [0], [0], [1], [0, 0, 1, 1], [], []>} : vector<16x32xf32>, vector<32x32xf32>, vector<16x32xf32> -> vector<16x32xf32>
    %19 = tpu.concatenate %12, %14, %16, %18 in 0 : vector<16x32xf32>, vector<16x32xf32>, vector<16x32xf32>, vector<16x32xf32> -> vector<64x32xf32>
    %20 = arith.addf %19, %8 : vector<64x32xf32>
    %21 = vector.extract_strided_slice %7 {offsets = [0, 0], sizes = [32, 32], strides = [1, 1]} : vector<128x32xf32> to vector<32x32xf32>
    %cst_17 = arith.constant dense<0.000000e+00> : vector<16x32xf32>
    %22 = tpu.matmul %1, %21, %cst_17 {dimension_numbers = #tpu.dot_dimension_numbers<[1], [0], [0], [1], [0, 0, 1, 1], [], []>} : vector<16x32xf32>, vector<32x32xf32>, vector<16x32xf32> -> vector<16x32xf32>
    %23 = vector.extract_strided_slice %7 {offsets = [32, 0], sizes = [32, 32], strides = [1, 1]} : vector<128x32xf32> to vector<32x32xf32>
    %cst_18 = arith.constant dense<0.000000e+00> : vector<16x32xf32>
    %24 = tpu.matmul %1, %23, %cst_18 {dimension_numbers = #tpu.dot_dimension_numbers<[1], [0], [0], [1], [0, 0, 1, 1], [], []>} : vector<16x32xf32>, vector<32x32xf32>, vector<16x32xf32> -> vector<16x32xf32>
    %25 = vector.extract_strided_slice %7 {offsets = [64, 0], sizes = [32, 32], strides = [1, 1]} : vector<128x32xf32> to vector<32x32xf32>
    %cst_19 = arith.constant dense<0.000000e+00> : vector<16x32xf32>
    %26 = tpu.matmul %1, %25, %cst_19 {dimension_numbers = #tpu.dot_dimension_numbers<[1], [0], [0], [1], [0, 0, 1, 1], [], []>} : vector<16x32xf32>, vector<32x32xf32>, vector<16x32xf32> -> vector<16x32xf32>
    %27 = vector.extract_strided_slice %7 {offsets = [96, 0], sizes = [32, 32], strides = [1, 1]} : vector<128x32xf32> to vector<32x32xf32>
    %cst_20 = arith.constant dense<0.000000e+00> : vector<16x32xf32>
    %28 = tpu.matmul %1, %27, %cst_20 {dimension_numbers = #tpu.dot_dimension_numbers<[1], [0], [0], [1], [0, 0, 1, 1], [], []>} : vector<16x32xf32>, vector<32x32xf32>, vector<16x32xf32> -> vector<16x32xf32>
    %29 = tpu.concatenate %22, %24, %26, %28 in 0 : vector<16x32xf32>, vector<16x32xf32>, vector<16x32xf32>, vector<16x32xf32> -> vector<64x32xf32>
    %30 = tpu.concatenate %5, %5, %5, %5 in 0 : vector<16x32xf32>, vector<16x32xf32>, vector<16x32xf32>, vector<16x32xf32> -> vector<64x32xf32>
    %cst_21 = arith.constant dense<0.000000e+00> : vector<64x64xf32>
    %31 = tpu.matmul %20, %30, %cst_21 {dimension_numbers = #tpu.dot_dimension_numbers<[1], [1], [0], [0], [0, 0, 1, 0], [], []>} : vector<64x32xf32>, vector<64x32xf32>, vector<64x64xf32> -> vector<64x64xf32>
    %32 = arith.addf %31, %9 : vector<64x64xf32>
    %cst_22 = arith.constant dense<0xFF800000> : vector<64xf32>
    %33 = vector.multi_reduction <maximumf>, %32, %cst_22 [1] : vector<64x64xf32> to vector<64xf32>
    %34 = vector.shape_cast %33 : vector<64xf32> to vector<64x1xf32>
    %35 = vector.broadcast %34 : vector<64x1xf32> to vector<64x64xf32>
    %36 = arith.subf %32, %35 : vector<64x64xf32>
    %37 = math.exp %36 : vector<64x64xf32>
    %cst_23 = arith.constant dense<0.000000e+00> : vector<64xf32>
    %38 = vector.multi_reduction <add>, %37, %cst_23 [1] : vector<64x64xf32> to vector<64xf32>
    %39 = vector.shape_cast %38 : vector<64xf32> to vector<64x1xf32>
    %40 = tpu.reciprocal %39 {approx = true} : vector<64x1xf32> -> vector<64x1xf32>
    %41 = vector.broadcast %40 : vector<64x1xf32> to vector<64x64xf32>
    %42 = arith.mulf %37, %41 : vector<64x64xf32>
    %cst_24 = arith.constant dense<0.000000e+00> : vector<64x32xf32>
    %43 = tpu.matmul %42, %29, %cst_24 {dimension_numbers = #tpu.dot_dimension_numbers<[1], [0], [0], [1], [0, 0, 1, 1], [], []>} : vector<64x64xf32>, vector<64x32xf32>, vector<64x32xf32> -> vector<64x32xf32>
    %44 = vector.extract_strided_slice %43 {offsets = [0, 0], sizes = [16, 32], strides = [1, 1]} : vector<64x32xf32> to vector<16x32xf32>
    %45 = vector.broadcast %10 : vector<1x32xf32> to vector<16x32xf32>
    %46 = arith.addf %45, %44 : vector<16x32xf32>
    %47 = vector.extract_strided_slice %43 {offsets = [16, 0], sizes = [16, 32], strides = [1, 1]} : vector<64x32xf32> to vector<16x32xf32>
    %48 = arith.addf %46, %47 : vector<16x32xf32>
    %49 = vector.extract_strided_slice %43 {offsets = [32, 0], sizes = [16, 32], strides = [1, 1]} : vector<64x32xf32> to vector<16x32xf32>
    %50 = arith.addf %48, %49 : vector<16x32xf32>
    %51 = vector.extract_strided_slice %43 {offsets = [48, 0], sizes = [16, 32], strides = [1, 1]} : vector<64x32xf32> to vector<16x32xf32>
    %52 = arith.addf %50, %51 : vector<16x32xf32>
    %53 = arith.addf %1, %52 : vector<16x32xf32>
    %54 = vector.extract_strided_slice %0 {offsets = [3, 0], sizes = [1, 32], strides = [1, 1]} : vector<16x32xf32> to vector<1x32xf32>
    %55 = vector.extract_strided_slice %0 {offsets = [4, 0], sizes = [1, 32], strides = [1, 1]} : vector<16x32xf32> to vector<1x32xf32>
    %cst_25 = arith.constant dense<0.000000e+00> : vector<16xf32>
    %56 = vector.multi_reduction <add>, %53, %cst_25 [1] : vector<16x32xf32> to vector<16xf32>
    %57 = vector.shape_cast %56 : vector<16xf32> to vector<16x1xf32>
    %cst_26 = arith.constant 3.200000e+01 : f32
    %58 = vector.broadcast %cst_26 : f32 to vector<16x1xf32>
    %59 = arith.divf %57, %58 : vector<16x1xf32>
    %60 = vector.broadcast %59 : vector<16x1xf32> to vector<16x32xf32>
    %61 = arith.subf %53, %60 : vector<16x32xf32>
    %62 = arith.mulf %61, %61 : vector<16x32xf32>
    %cst_27 = arith.constant dense<0.000000e+00> : vector<16xf32>
    %63 = vector.multi_reduction <add>, %62, %cst_27 [1] : vector<16x32xf32> to vector<16xf32>
    %64 = vector.shape_cast %63 : vector<16xf32> to vector<16x1xf32>
    %cst_28 = arith.constant 3.200000e+01 : f32
    %65 = vector.broadcast %cst_28 : f32 to vector<16x1xf32>
    %66 = arith.divf %64, %65 : vector<16x1xf32>
    %cst_29 = arith.constant 9.99999974E-6 : f32
    %67 = vector.broadcast %cst_29 : f32 to vector<16x1xf32>
    %68 = arith.addf %66, %67 : vector<16x1xf32>
    %69 = math.rsqrt %68 : vector<16x1xf32>
    %70 = vector.broadcast %69 : vector<16x1xf32> to vector<16x32xf32>
    %71 = arith.mulf %61, %70 : vector<16x32xf32>
    %72 = vector.broadcast %54 : vector<1x32xf32> to vector<16x32xf32>
    %73 = arith.mulf %71, %72 : vector<16x32xf32>
    %74 = vector.broadcast %55 : vector<1x32xf32> to vector<16x32xf32>
    %75 = arith.addf %73, %74 : vector<16x32xf32>
    %76 = arith.addf %75, %3 : vector<16x32xf32>
    %77 = arith.addf %2, %4 : vector<16x32xf32>
    %c256 = arith.constant 256 : index
    %c0_30 = arith.constant 0 : index
    %78 = vector.load %arg4[%c256, %c0_30] : memref<720x32xf32, #tpu.memory_space<vmem>>, vector<128x32xf32>
    %c384 = arith.constant 384 : index
    %c0_31 = arith.constant 0 : index
    %79 = vector.load %arg4[%c384, %c0_31] : memref<720x32xf32, #tpu.memory_space<vmem>>, vector<128x32xf32>
    %c656 = arith.constant 656 : index
    %c0_32 = arith.constant 0 : index
    %80 = vector.load %arg4[%c656, %c0_32] : memref<720x32xf32, #tpu.memory_space<vmem>>, vector<64x32xf32>
    %c0_33 = arith.constant 0 : index
    %c0_34 = arith.constant 0 : index
    %81 = vector.load %arg7[%c0_33, %c0_34] : memref<64x64xf32, #tpu.memory_space<vmem>>, vector<64x64xf32>
    %82 = vector.extract_strided_slice %0 {offsets = [1, 0], sizes = [1, 32], strides = [1, 1]} : vector<16x32xf32> to vector<1x32xf32>
    %83 = vector.extract_strided_slice %78 {offsets = [0, 0], sizes = [32, 32], strides = [1, 1]} : vector<128x32xf32> to vector<32x32xf32>
    %cst_35 = arith.constant dense<0.000000e+00> : vector<16x32xf32>
    %84 = tpu.matmul %76, %83, %cst_35 {dimension_numbers = #tpu.dot_dimension_numbers<[1], [0], [0], [1], [0, 0, 1, 1], [], []>} : vector<16x32xf32>, vector<32x32xf32>, vector<16x32xf32> -> vector<16x32xf32>
    %85 = vector.extract_strided_slice %78 {offsets = [32, 0], sizes = [32, 32], strides = [1, 1]} : vector<128x32xf32> to vector<32x32xf32>
    %cst_36 = arith.constant dense<0.000000e+00> : vector<16x32xf32>
    %86 = tpu.matmul %76, %85, %cst_36 {dimension_numbers = #tpu.dot_dimension_numbers<[1], [0], [0], [1], [0, 0, 1, 1], [], []>} : vector<16x32xf32>, vector<32x32xf32>, vector<16x32xf32> -> vector<16x32xf32>
    %87 = vector.extract_strided_slice %78 {offsets = [64, 0], sizes = [32, 32], strides = [1, 1]} : vector<128x32xf32> to vector<32x32xf32>
    %cst_37 = arith.constant dense<0.000000e+00> : vector<16x32xf32>
    %88 = tpu.matmul %76, %87, %cst_37 {dimension_numbers = #tpu.dot_dimension_numbers<[1], [0], [0], [1], [0, 0, 1, 1], [], []>} : vector<16x32xf32>, vector<32x32xf32>, vector<16x32xf32> -> vector<16x32xf32>
    %89 = vector.extract_strided_slice %78 {offsets = [96, 0], sizes = [32, 32], strides = [1, 1]} : vector<128x32xf32> to vector<32x32xf32>
    %cst_38 = arith.constant dense<0.000000e+00> : vector<16x32xf32>
    %90 = tpu.matmul %76, %89, %cst_38 {dimension_numbers = #tpu.dot_dimension_numbers<[1], [0], [0], [1], [0, 0, 1, 1], [], []>} : vector<16x32xf32>, vector<32x32xf32>, vector<16x32xf32> -> vector<16x32xf32>
    %91 = tpu.concatenate %84, %86, %88, %90 in 0 : vector<16x32xf32>, vector<16x32xf32>, vector<16x32xf32>, vector<16x32xf32> -> vector<64x32xf32>
    %92 = arith.addf %91, %80 : vector<64x32xf32>
    %93 = vector.extract_strided_slice %79 {offsets = [0, 0], sizes = [32, 32], strides = [1, 1]} : vector<128x32xf32> to vector<32x32xf32>
    %cst_39 = arith.constant dense<0.000000e+00> : vector<16x32xf32>
    %94 = tpu.matmul %2, %93, %cst_39 {dimension_numbers = #tpu.dot_dimension_numbers<[1], [0], [0], [1], [0, 0, 1, 1], [], []>} : vector<16x32xf32>, vector<32x32xf32>, vector<16x32xf32> -> vector<16x32xf32>
    %95 = vector.extract_strided_slice %79 {offsets = [32, 0], sizes = [32, 32], strides = [1, 1]} : vector<128x32xf32> to vector<32x32xf32>
    %cst_40 = arith.constant dense<0.000000e+00> : vector<16x32xf32>
    %96 = tpu.matmul %2, %95, %cst_40 {dimension_numbers = #tpu.dot_dimension_numbers<[1], [0], [0], [1], [0, 0, 1, 1], [], []>} : vector<16x32xf32>, vector<32x32xf32>, vector<16x32xf32> -> vector<16x32xf32>
    %97 = vector.extract_strided_slice %79 {offsets = [64, 0], sizes = [32, 32], strides = [1, 1]} : vector<128x32xf32> to vector<32x32xf32>
    %cst_41 = arith.constant dense<0.000000e+00> : vector<16x32xf32>
    %98 = tpu.matmul %2, %97, %cst_41 {dimension_numbers = #tpu.dot_dimension_numbers<[1], [0], [0], [1], [0, 0, 1, 1], [], []>} : vector<16x32xf32>, vector<32x32xf32>, vector<16x32xf32> -> vector<16x32xf32>
    %99 = vector.extract_strided_slice %79 {offsets = [96, 0], sizes = [32, 32], strides = [1, 1]} : vector<128x32xf32> to vector<32x32xf32>
    %cst_42 = arith.constant dense<0.000000e+00> : vector<16x32xf32>
    %100 = tpu.matmul %2, %99, %cst_42 {dimension_numbers = #tpu.dot_dimension_numbers<[1], [0], [0], [1], [0, 0, 1, 1], [], []>} : vector<16x32xf32>, vector<32x32xf32>, vector<16x32xf32> -> vector<16x32xf32>
    %101 = tpu.concatenate %94, %96, %98, %100 in 0 : vector<16x32xf32>, vector<16x32xf32>, vector<16x32xf32>, vector<16x32xf32> -> vector<64x32xf32>
    %102 = tpu.concatenate %77, %77, %77, %77 in 0 : vector<16x32xf32>, vector<16x32xf32>, vector<16x32xf32>, vector<16x32xf32> -> vector<64x32xf32>
    %cst_43 = arith.constant dense<0.000000e+00> : vector<64x64xf32>
    %103 = tpu.matmul %92, %102, %cst_43 {dimension_numbers = #tpu.dot_dimension_numbers<[1], [1], [0], [0], [0, 0, 1, 0], [], []>} : vector<64x32xf32>, vector<64x32xf32>, vector<64x64xf32> -> vector<64x64xf32>
    %104 = arith.addf %103, %81 : vector<64x64xf32>
    %cst_44 = arith.constant dense<0xFF800000> : vector<64xf32>
    %105 = vector.multi_reduction <maximumf>, %104, %cst_44 [1] : vector<64x64xf32> to vector<64xf32>
    %106 = vector.shape_cast %105 : vector<64xf32> to vector<64x1xf32>
    %107 = vector.broadcast %106 : vector<64x1xf32> to vector<64x64xf32>
    %108 = arith.subf %104, %107 : vector<64x64xf32>
    %109 = math.exp %108 : vector<64x64xf32>
    %cst_45 = arith.constant dense<0.000000e+00> : vector<64xf32>
    %110 = vector.multi_reduction <add>, %109, %cst_45 [1] : vector<64x64xf32> to vector<64xf32>
    %111 = vector.shape_cast %110 : vector<64xf32> to vector<64x1xf32>
    %112 = tpu.reciprocal %111 {approx = true} : vector<64x1xf32> -> vector<64x1xf32>
    %113 = vector.broadcast %112 : vector<64x1xf32> to vector<64x64xf32>
    %114 = arith.mulf %109, %113 : vector<64x64xf32>
    %cst_46 = arith.constant dense<0.000000e+00> : vector<64x32xf32>
    %115 = tpu.matmul %114, %101, %cst_46 {dimension_numbers = #tpu.dot_dimension_numbers<[1], [0], [0], [1], [0, 0, 1, 1], [], []>} : vector<64x64xf32>, vector<64x32xf32>, vector<64x32xf32> -> vector<64x32xf32>
    %116 = vector.extract_strided_slice %115 {offsets = [0, 0], sizes = [16, 32], strides = [1, 1]} : vector<64x32xf32> to vector<16x32xf32>
    %117 = vector.broadcast %82 : vector<1x32xf32> to vector<16x32xf32>
    %118 = arith.addf %117, %116 : vector<16x32xf32>
    %119 = vector.extract_strided_slice %115 {offsets = [16, 0], sizes = [16, 32], strides = [1, 1]} : vector<64x32xf32> to vector<16x32xf32>
    %120 = arith.addf %118, %119 : vector<16x32xf32>
    %121 = vector.extract_strided_slice %115 {offsets = [32, 0], sizes = [16, 32], strides = [1, 1]} : vector<64x32xf32> to vector<16x32xf32>
    %122 = arith.addf %120, %121 : vector<16x32xf32>
    %123 = vector.extract_strided_slice %115 {offsets = [48, 0], sizes = [16, 32], strides = [1, 1]} : vector<64x32xf32> to vector<16x32xf32>
    %124 = arith.addf %122, %123 : vector<16x32xf32>
    %125 = arith.addf %75, %124 : vector<16x32xf32>
    %126 = vector.extract_strided_slice %0 {offsets = [5, 0], sizes = [1, 32], strides = [1, 1]} : vector<16x32xf32> to vector<1x32xf32>
    %127 = vector.extract_strided_slice %0 {offsets = [6, 0], sizes = [1, 32], strides = [1, 1]} : vector<16x32xf32> to vector<1x32xf32>
    %cst_47 = arith.constant dense<0.000000e+00> : vector<16xf32>
    %128 = vector.multi_reduction <add>, %125, %cst_47 [1] : vector<16x32xf32> to vector<16xf32>
    %129 = vector.shape_cast %128 : vector<16xf32> to vector<16x1xf32>
    %cst_48 = arith.constant 3.200000e+01 : f32
    %130 = vector.broadcast %cst_48 : f32 to vector<16x1xf32>
    %131 = arith.divf %129, %130 : vector<16x1xf32>
    %132 = vector.broadcast %131 : vector<16x1xf32> to vector<16x32xf32>
    %133 = arith.subf %125, %132 : vector<16x32xf32>
    %134 = arith.mulf %133, %133 : vector<16x32xf32>
    %cst_49 = arith.constant dense<0.000000e+00> : vector<16xf32>
    %135 = vector.multi_reduction <add>, %134, %cst_49 [1] : vector<16x32xf32> to vector<16xf32>
    %136 = vector.shape_cast %135 : vector<16xf32> to vector<16x1xf32>
    %cst_50 = arith.constant 3.200000e+01 : f32
    %137 = vector.broadcast %cst_50 : f32 to vector<16x1xf32>
    %138 = arith.divf %136, %137 : vector<16x1xf32>
    %cst_51 = arith.constant 9.99999974E-6 : f32
    %139 = vector.broadcast %cst_51 : f32 to vector<16x1xf32>
    %140 = arith.addf %138, %139 : vector<16x1xf32>
    %141 = math.rsqrt %140 : vector<16x1xf32>
    %142 = vector.broadcast %141 : vector<16x1xf32> to vector<16x32xf32>
    %143 = arith.mulf %133, %142 : vector<16x32xf32>
    %144 = vector.broadcast %126 : vector<1x32xf32> to vector<16x32xf32>
    %145 = arith.mulf %143, %144 : vector<16x32xf32>
    %146 = vector.broadcast %127 : vector<1x32xf32> to vector<16x32xf32>
    %147 = arith.addf %145, %146 : vector<16x32xf32>
    %c0_52 = arith.constant 0 : index
    %c0_53 = arith.constant 0 : index
    %148 = vector.load %arg5[%c0_52, %c0_53] : memref<33x64xf32, #tpu.memory_space<vmem>>, vector<32x64xf32>
    %c32 = arith.constant 32 : index
    %c0_54 = arith.constant 0 : index
    %149 = vector.load %arg5[%c32, %c0_54] : memref<33x64xf32, #tpu.memory_space<vmem>>, vector<1x64xf32>
    %cst_55 = arith.constant dense<0.000000e+00> : vector<16x64xf32>
    %150 = tpu.matmul %147, %148, %cst_55 {dimension_numbers = #tpu.dot_dimension_numbers<[1], [0], [0], [1], [0, 0, 1, 1], [], []>} : vector<16x32xf32>, vector<32x64xf32>, vector<16x64xf32> -> vector<16x64xf32>
    %151 = vector.broadcast %149 : vector<1x64xf32> to vector<16x64xf32>
    %152 = arith.addf %150, %151 : vector<16x64xf32>
    %cst_56 = arith.constant 0.000000e+00 : f32
    %153 = vector.broadcast %cst_56 : f32 to vector<16x64xf32>
    %154 = arith.maximumf %152, %153 : vector<16x64xf32>
    %c512 = arith.constant 512 : index
    %c0_57 = arith.constant 0 : index
    %155 = vector.load %arg4[%c512, %c0_57] : memref<720x32xf32, #tpu.memory_space<vmem>>, vector<64x32xf32>
    %cst_58 = arith.constant dense<0.000000e+00> : vector<16x32xf32>
    %156 = tpu.matmul %154, %155, %cst_58 {dimension_numbers = #tpu.dot_dimension_numbers<[1], [0], [0], [1], [0, 0, 1, 1], [], []>} : vector<16x64xf32>, vector<64x32xf32>, vector<16x32xf32> -> vector<16x32xf32>
    %157 = vector.extract_strided_slice %0 {offsets = [2, 0], sizes = [1, 32], strides = [1, 1]} : vector<16x32xf32> to vector<1x32xf32>
    %158 = vector.broadcast %157 : vector<1x32xf32> to vector<16x32xf32>
    %159 = arith.addf %156, %158 : vector<16x32xf32>
    %160 = arith.addf %147, %159 : vector<16x32xf32>
    %161 = vector.extract_strided_slice %0 {offsets = [7, 0], sizes = [1, 32], strides = [1, 1]} : vector<16x32xf32> to vector<1x32xf32>
    %162 = vector.extract_strided_slice %0 {offsets = [8, 0], sizes = [1, 32], strides = [1, 1]} : vector<16x32xf32> to vector<1x32xf32>
    %cst_59 = arith.constant dense<0.000000e+00> : vector<16xf32>
    %163 = vector.multi_reduction <add>, %160, %cst_59 [1] : vector<16x32xf32> to vector<16xf32>
    %164 = vector.shape_cast %163 : vector<16xf32> to vector<16x1xf32>
    %cst_60 = arith.constant 3.200000e+01 : f32
    %165 = vector.broadcast %cst_60 : f32 to vector<16x1xf32>
    %166 = arith.divf %164, %165 : vector<16x1xf32>
    %167 = vector.broadcast %166 : vector<16x1xf32> to vector<16x32xf32>
    %168 = arith.subf %160, %167 : vector<16x32xf32>
    %169 = arith.mulf %168, %168 : vector<16x32xf32>
    %cst_61 = arith.constant dense<0.000000e+00> : vector<16xf32>
    %170 = vector.multi_reduction <add>, %169, %cst_61 [1] : vector<16x32xf32> to vector<16xf32>
    %171 = vector.shape_cast %170 : vector<16xf32> to vector<16x1xf32>
    %cst_62 = arith.constant 3.200000e+01 : f32
    %172 = vector.broadcast %cst_62 : f32 to vector<16x1xf32>
    %173 = arith.divf %171, %172 : vector<16x1xf32>
    %cst_63 = arith.constant 9.99999974E-6 : f32
    %174 = vector.broadcast %cst_63 : f32 to vector<16x1xf32>
    %175 = arith.addf %173, %174 : vector<16x1xf32>
    %176 = math.rsqrt %175 : vector<16x1xf32>
    %177 = vector.broadcast %176 : vector<16x1xf32> to vector<16x32xf32>
    %178 = arith.mulf %168, %177 : vector<16x32xf32>
    %179 = vector.broadcast %161 : vector<1x32xf32> to vector<16x32xf32>
    %180 = arith.mulf %178, %179 : vector<16x32xf32>
    %181 = vector.broadcast %162 : vector<1x32xf32> to vector<16x32xf32>
    %182 = arith.addf %180, %181 : vector<16x32xf32>
    %c0_64 = arith.constant 0 : index
    %c0_65 = arith.constant 0 : index
    %183 = vector.load %arg8[%c0_64, %c0_65] : memref<16x32xf32, #tpu.memory_space<vmem>>, vector<16x32xf32>
    tpu.vector_store %arg8[%c0_64, %c0_65], %182 {strides = array<i32>} : memref<16x32xf32, #tpu.memory_space<vmem>>, vector<16x32xf32>,
    return
  }
}

</mosaic_0001>

<bundles_post_ra>
// kernel: transformer_decoder_layer.1
= control target key start
LH: loop header
LB: loop body
LE: loop exit
PB: predicated region body
PF: predicated region fallthrough
CT: control target
= control target key end

     0   :  { %vm90_vm0 = vcmask 261120   ;;  %s3751_s0 = inlined_call_operand.vmem [shape: f32[16,32], index: 0, kind: input, shape index: {}]   ;;  %s3752_s1 = inlined_call_operand.vmem [shape: f32[16,32], index: 1, kind: input, shape index: {}]   ;;  %s3753_s2 = inlined_call_operand.vmem [shape: f32[16,32], index: 2, kind: input, shape index: {}]   ;;  %s3754_s3 = inlined_call_operand.vmem [shape: f32[16,32], index: 3, kind: input, shape index: {}]   ;;  %s3755_s4 = inlined_call_operand.vmem [shape: f32[720,32], index: 4, kind: input, shape index: {}]   ;;  %s3756_s5 = inlined_call_operand.vmem [shape: f32[33,64], index: 5, kind: input, shape index: {}]   ;;  %s3757_s6 = inlined_call_operand.vmem [shape: f32[64,64], index: 6, kind: input, shape index: {}]   ;;  %s3758_s7 = inlined_call_operand.vmem [shape: f32[64,64], index: 7, kind: input, shape index: {}]   ;;  %s3759_s8 = inlined_call_operand.hbm [shape: f32[16,32], index: 8, kind: output, shape index: {}]  }
   0x1   :  { %v45_v0 = vld [vmem:[%s3755_s4 + $0x18] sm:$0xff]  ;;  %v44_v1 = vld [vmem:[%s3755_s4 + $0x10] sm:$0xff]  ;;  %v3168_v2 = vld [vmem:[%s3751_s0] sm:$0xff] }
   0x2   :  { %2691 = vmatprep.subr.mxu1 %v45_v0  ;;  %v3173_v3 = vld [vmem:[%s3753_s2] sm:$0xff]  ;;  %v43_v4 = vld [vmem:[%s3755_s4 + $0x8] sm:$0xff]  ;;  %v53_v8 = vld [vmem:[%s3755_s4 + $0x58] sm:$0xff] }
   0x3   :  { %2692 = vmatpush3.msra.mxu1 %v45_v0  ;;  %v3180_v5 = vadd.f32 %v3173_v3, %v3168_v2  ;;  %v3185_v6 = vld [vmem:[%s3751_s0 + $0x8] sm:$0xff]  ;;  %v42_v9 = vld [vmem:[%s3755_s4] sm:$0xff]  ;;  %v52_v10 = vld [vmem:[%s3755_s4 + $0x50] sm:$0xff]  ;;  %2713 = vmatprep.subr.mxu0 %v53_v8 }
   0x4   :  { %v3190_v7 = vld [vmem:[%s3753_s2 + $0x8] sm:$0xff]  ;;  %2693 = vmatprep.subr.mxu1 %v44_v1  ;;  %v49_v12 = vld [vmem:[%s3755_s4 + $0x38] sm:$0xff]  ;;  %2714 = vmatpush3.msra.mxu0 %v53_v8  ;;  %v48_v13 = vld [vmem:[%s3755_s4 + $0x30] sm:$0xff] }
   0x5   :  { %2694 = vmatpush3.msra.mxu1 %v44_v1  ;;  %2699 = vmatprep.mubr.msk.f32.mxu1 %vm90_vm0, %v3180_v5  ;;  %v3205_v11 = vadd.f32 %v3190_v7, %v3185_v6  ;;  %v51_v14 = vld [vmem:[%s3755_s4 + $0x48] sm:$0xff]  ;;  %v50_v16 = vld [vmem:[%s3755_s4 + $0x40] sm:$0xff] }
   0x6   :  { %2695 = vmatprep.subr.mxu1 %v43_v4  ;;  %2715 = vmatprep.subr.mxu0 %v52_v10  ;;  %v47_v15 = vld [vmem:[%s3755_s4 + $0x28] sm:$0xff]  ;;  %v46_v17 = vld [vmem:[%s3755_s4 + $0x20] sm:$0xff] }
   0x7   :  { %2696 = vmatpush3.msra.mxu1 %v43_v4  ;;  %2716 = vmatpush3.msra.mxu0 %v52_v10 }
   0x8   :  { %2697 = vmatprep.subr.mxu1 %v42_v9  ;;  %2717 = vmatprep.subr.mxu0 %v51_v14 }
   0x9   :  { %2698 = vmatpush3.msra.mxu1 %v42_v9  ;;  %2718 = vmatpush3.msra.mxu0 %v51_v14 }
   0xa   :  { %2700 = vmatmul.mubr.msk.f32.vlgmr.msra.gmra.mxu1 %vm90_vm0, %v3205_v11  ;;  %2702 = vmatprep.subr.mxu1 %v49_v12 }
   0xb   :  { %2703 = vmatpush3.msra.mxu1 %v49_v12  ;;  %2710 = vmatprep.mubr.msk.f32.mxu1 %vm90_vm0, %v3180_v5 }
   0xc   :  { %2704 = vmatprep.subr.mxu1 %v48_v13 }
   0xd   :  { %2705 = vmatpush3.msra.mxu1 %v48_v13 }
   0xe   :  { %13 = vsyncpa [#allocation3], 0  ;;  %2706 = vmatprep.subr.mxu1 %v47_v15  ;;  %2719 = vmatprep.subr.mxu0 %v50_v16  ;;  %v57_v18 = vld [vmem:[%s3755_s4 + $0x78] sm:$0xff]  ;;  %v56_v19 = vld [vmem:[%s3755_s4 + $0x70] sm:$0xff]  ;;  %vm840_vm1 = vcmask 523264   ;;  %s3111_s14 = smov [#allocation2]  }
   0xf   :  { %2707 = vmatpush3.msra.mxu1 %v47_v15  ;;  %2720 = vmatpush3.msra.mxu0 %v50_v16  ;;  %v61_v20 = vld [vmem:[%s3755_s4 + $0x98] sm:$0xff]  ;;  %v55_v21 = vld [vmem:[%s3755_s4 + $0x68] sm:$0xff]  ;;  %v60_v22 = vld [vmem:[%s3755_s4 + $0x90] sm:$0xff]  ;;  %s2419_s15 = sshll.u32 %s3111_s14, 4  ;;  %s2420_s15 = int_to_ptr.vmem [resolvable:$true] %s2419_s15 }
  0x10   :  { %2708 = vmatprep.subr.mxu1 %v46_v17  ;;  %2721 = vmatprep.mubr.msk.f32.mxu0 %vm90_vm0, %v3180_v5  ;;  %v54_v23 = vld [vmem:[%s3755_s4 + $0x60] sm:$0xff]  ;;  %v59_v24 = vld [vmem:[%s3755_s4 + $0x88] sm:$0xff]  ;;  %v65_v25 = vld [vmem:[%s3755_s4 + $0xb8] sm:$0xff]  ;;  %p3094_p1 = scmp.lt.s32.totalorder %s2420_s15, %s2420_s15 }
  0x11   :  { %2709 = vmatpush3.msra.mxu1 %v46_v17  ;;  %2722 = vmatmul.mubr.msk.f32.vlgmr.msra.gmra.mxu0 %vm90_vm0, %v3205_v11  ;;  %v64_v26 = vld [vmem:[%s3755_s4 + $0xb0] sm:$0xff]  ;;  %v58_v27 = vld [vmem:[%s3755_s4 + $0x80] sm:$0xff]  ;;  %v63_v28 = vld [vmem:[%s3755_s4 + $0xa8] sm:$0xff] }
  0x12   :  { %2711 = vmatmul.mubr.msk.f32.vlgmr.msra.gmra.mxu1 %vm90_vm0, %v3205_v11  ;;  %2724 = vmatprep.subr.mxu1 %v57_v18  ;;  %v69_v29 = vld [vmem:[%s3755_s4 + $0xd8] sm:$0xff]  ;;  %v62_v30 = vld [vmem:[%s3755_s4 + $0xa0] sm:$0xff]  ;;  %v68_v32 = vld [vmem:[%s3755_s4 + $0xd0] sm:$0xff] }
  0x13   :  { %2725 = vmatpush3.msra.mxu1 %v57_v18  ;;  %2732 = vmatprep.mubr.msk.f32.mxu1 %vm90_vm0, %v3180_v5  ;;  %v73_v31 = vld [vmem:[%s3755_s4 + $0xf8] sm:$0xff]  ;;  %v72_v33 = vld [vmem:[%s3755_s4 + $0xf0] sm:$0xff]  ;;  %v71_v34 = vld [vmem:[%s3755_s4 + $0xe8] sm:$0xff] }
  0x14   :  { %2726 = vmatprep.subr.mxu1 %v56_v19  ;;  %2735 = vmatprep.subr.mxu0 %v61_v20  ;;  %v67_v35 = vld [vmem:[%s3755_s4 + $0xc8] sm:$0xff]  ;;  %v70_v36 = vld [vmem:[%s3755_s4 + $0xe0] sm:$0xff]  ;;  %v74_v39 = vld [vmem:[%s3755_s4 + $0x250] sm:$0xff] }
  0x15   :  { %2727 = vmatpush3.msra.mxu1 %v56_v19  ;;  %2736 = vmatpush3.msra.mxu0 %v61_v20  ;;  %v66_v37 = vld [vmem:[%s3755_s4 + $0xc0] sm:$0xff]  ;;  %v75_v40 = vld [vmem:[%s3755_s4 + $0x258] sm:$0xff]  ;;  %v78_v47 = vld [vmem:[%s3755_s4 + $0x270] sm:$0xff] }
  0x16   :  { %2728 = vmatprep.subr.mxu1 %v55_v21  ;;  %2737 = vmatprep.subr.mxu0 %v60_v22  ;;  %v76_v46 = vld [vmem:[%s3755_s4 + $0x260] sm:$0xff]  ;;  %v77_v48 = vld [vmem:[%s3755_s4 + $0x268] sm:$0xff]  ;;  %v79_v52 = vld [vmem:[%s3755_s4 + $0x278] sm:$0xff] }
  0x17   :  { %2729 = vmatpush3.msra.mxu1 %v55_v21  ;;  %2738 = vmatpush3.msra.mxu0 %v60_v22  ;;  %v81_v56 = vld [vmem:[%s3755_s4 + $0x288] sm:$0xff]  ;;  %v80_v58 = vld [vmem:[%s3755_s4 + $0x280] sm:$0xff]  ;;  %v84_v18 = vld [vmem:[%s3757_s6 + $0x10] sm:$0xff] }
  0x18   :  { %2730 = vmatprep.subr.mxu1 %v54_v23  ;;  %2739 = vmatprep.subr.mxu0 %v59_v24  ;;  %v83_v12 = vld [vmem:[%s3757_s6 + $0x8] sm:$0xff]  ;;  %v85_v20 = vld [vmem:[%s3757_s6 + $0x18] sm:$0xff] }
  0x19   :  { %2731 = vmatpush3.msra.mxu1 %v54_v23  ;;  %2740 = vmatpush3.msra.mxu0 %v59_v24  ;;  %v86_v24 = vld [vmem:[%s3757_s6 + $0x20] sm:$0xff] }
  0x1a   :  { %2733 = vmatmul.mubr.msk.f32.vlgmr.msra.gmra.mxu1 %vm90_vm0, %v3205_v11  ;;  %2746 = vmatprep.subr.mxu1 %v65_v25 }
  0x1b   :  { %2747 = vmatpush3.msra.mxu1 %v65_v25  ;;  %2754 = vmatprep.mubr.msk.f32.mxu1 %vm90_vm0, %v3168_v2 }
  0x1c   :  { %2748 = vmatprep.subr.mxu1 %v64_v26  ;;  %2741 = vmatprep.subr.mxu0 %v58_v27 }
  0x1d   :  { %2749 = vmatpush3.msra.mxu1 %v64_v26  ;;  %2742 = vmatpush3.msra.mxu0 %v58_v27  ;;  %v87_v27 = vld [vmem:[%s3757_s6 + $0x28] sm:$0xff] }
  0x1e   :  { %2750 = vmatprep.subr.mxu1 %v63_v28  ;;  %2743 = vmatprep.mubr.msk.f32.mxu0 %vm90_vm0, %v3168_v2 }
  0x1f   :  { %2751 = vmatpush3.msra.mxu1 %v63_v28  ;;  %2757 = vmatprep.subr.mxu0 %v69_v29 }
  0x20   :  { %2752 = vmatprep.subr.mxu1 %v62_v30  ;;  %2744 = vmatmul.mubr.msk.f32.vlgmr.msra.gmra.mxu0 %vm90_vm0, %v3185_v6 }
  0x21   :  { %2753 = vmatpush3.msra.mxu1 %v62_v30  ;;  %2758 = vmatpush3.msra.mxu0 %v69_v29 }
  0x22   :  { %2768 = vmatprep.subr.mxu1 %v73_v31  ;;  %2755 = vmatmul.mubr.msk.f32.vlgmr.msra.gmra.mxu1 %vm90_vm0, %v3185_v6 }
  0x23   :  { %2769 = vmatpush3.msra.mxu1 %v73_v31  ;;  %2759 = vmatprep.subr.mxu0 %v68_v32  ;;  %v88_v31 = vld [vmem:[%s3757_s6 + $0x30] sm:$0xff] }
  0x24   :  { %2770 = vmatprep.subr.mxu1 %v72_v33  ;;  %2760 = vmatpush3.msra.mxu0 %v68_v32 }
  0x25   :  { %2771 = vmatpush3.msra.mxu1 %v72_v33  ;;  %2776 = vmatprep.mubr.msk.f32.mxu1 %vm90_vm0, %v3168_v2 }
  0x26   :  { %2772 = vmatprep.subr.mxu1 %v71_v34  ;;  %2761 = vmatprep.subr.mxu0 %v67_v35 }
  0x27   :  { %2773 = vmatpush3.msra.mxu1 %v71_v34  ;;  %2762 = vmatpush3.msra.mxu0 %v67_v35  ;;  %v89_v35 = vld [vmem:[%s3757_s6 + $0x38] sm:$0xff] }
  0x28   :  { %2774 = vmatprep.subr.mxu1 %v70_v36  ;;  %2763 = vmatprep.subr.mxu0 %v66_v37 }
  0x29   :  { %2775 = vmatpush3.msra.mxu1 %v70_v36  ;;  %2764 = vmatpush3.msra.mxu0 %v66_v37 }
  0x2a   :  { %2777 = vmatmul.mubr.msk.f32.vlgmr.msra.gmra.mxu1 %vm90_vm0, %v3185_v6  ;;  %2765 = vmatprep.mubr.msk.f32.mxu0 %vm90_vm0, %v3168_v2 }
  0x2b   :  { %2766 = vmatmul.mubr.msk.f32.vlgmr.msra.gmra.mxu0 %vm90_vm0, %v3185_v6  ;;  %2779 = vmatprep.subr.msk.mxu0 %vm90_vm0, %v3205_v11 }
  0x2c   :  { %2780 = vmatpush3.xpose.msk.msra.mxu0 %vm90_vm0, %v3205_v11 }
  0x2d   :  { %2781 = vmatprep.subr.msk.mxu0 %vm90_vm0, %v3180_v5 }
  0x30   :  { %2782 = vmatpush3.xpose.msk.msra.mxu0 %vm90_vm0, %v3180_v5 }
  0x31   :  { %2783 = vmatprep.subr.msk.mxu0 %vm90_vm0, %v3205_v11 }
  0x34   :  { %2784 = vmatpush3.xpose.msk.msra.mxu0 %vm90_vm0, %v3205_v11 }
  0x35   :  { %2785 = vmatprep.subr.msk.mxu0 %vm90_vm0, %v3180_v5 }
  0x38   :  { %2786 = vmatpush3.xpose.msk.msra.mxu0 %vm90_vm0, %v3180_v5 }
  0x39   :  { %2787 = vmatprep.subr.msk.mxu0 %vm90_vm0, %v3205_v11 }
  0x3c   :  { %2788 = vmatpush3.xpose.msk.msra.mxu0 %vm90_vm0, %v3205_v11 }
  0x3d   :  { %2789 = vmatprep.subr.msk.mxu0 %vm90_vm0, %v3180_v5 }
  0x40   :  { %2790 = vmatpush3.xpose.msk.msra.mxu0 %vm90_vm0, %v3180_v5 }
  0x41   :  { %2791 = vmatprep.subr.msk.mxu0 %vm90_vm0, %v3205_v11 }
  0x44   :  { %2792 = vmatpush3.xpose.msk.msra.mxu0 %vm90_vm0, %v3205_v11  ;;  %v82_v11 = vld [vmem:[%s3757_s6] sm:$0xff] }
  0x45   :  { %2793 = vmatprep.subr.msk.mxu0 %vm90_vm0, %v3180_v5 }
  0x48   :  { %2794 = vmatpush3.xpose.msk.msra.mxu0 %vm90_vm0, %v3180_v5 }
  0xca   :  { %v2701_v38 = vpop.f32.mrf.mxu1 }
  0xcb   :  { %v398_v43 = vadd.f32 %v2701_v38, %v75_v40 }
  0xcc   :  { %v163_v41 = vpop.f32.mrf.mxu1 }
  0xcd   :  { %v397_v42 = vadd.f32 %v163_v41, %v74_v39 }
  0xcf   :  { %2795 = vmatprep.mubr.msk.f32.mxu0 %vm90_vm0, %v397_v42 }
  0xd0   :  { %2796 = vmatmul.mubr.msk.f32.vlgmr.msra.gmra.mxu0 %vm90_vm0, %v398_v43 }
  0xd1   :  { %v2723_v44 = vpop.f32.mrf.mxu0 }
  0xd2   :  { %v2712_v45 = vpop.f32.mrf.mxu1  ;;  %v402_v55 = vadd.f32 %v2723_v44, %v79_v52 }
  0xd3   :  { %v313_v49 = vpop.f32.mrf.mxu0  ;;  %v400_v54 = vadd.f32 %v2712_v45, %v77_v48 }
  0xd4   :  { %v238_v50 = vpop.f32.mrf.mxu1  ;;  %v401_v53 = vadd.f32 %v313_v49, %v78_v47 }
  0xd5   :  { %v399_v51 = vadd.f32 %v238_v50, %v76_v46 }
  0xd7   :  { %2798 = vmatprep.mubr.msk.f32.mxu0 %vm90_vm0, %v399_v51 }
  0xd8   :  { %2799 = vmatmul.mubr.msk.f32.gmra.mxu0 %vm90_vm0, %v400_v54 }
  0xd9   :  { %2801 = vmatprep.mubr.msk.f32.mxu0 %vm90_vm0, %v401_v53 }
  0xda   :  { %v2734_v57 = vpop.f32.mrf.mxu1 }
  0xdb   :  { %v404_v59 = vadd.f32 %v2734_v57, %v81_v56 }
  0xdc   :  { %v388_v60 = vpop.f32.mrf.mxu1  ;;  %2802 = vmatmul.mubr.msk.f32.gmra.mxu0 %vm90_vm0, %v402_v55 }
  0xdd   :  { %v403_v61 = vadd.f32 %v388_v60, %v80_v58 }
  0xdf   :  { %2804 = vmatprep.mubr.msk.f32.mxu0 %vm90_vm0, %v403_v61 }
  0xe0   :  { %2805 = vmatmul.mubr.msk.f32.gmra.mxu0 %vm90_vm0, %v404_v59  ;;  %v2745_v63 = vpop.f32.mrf.mxu0 }
  0xe2   :  { %v2756_v62 = vpop.f32.mrf.mxu1  ;;  %v477_v1 = vpop.f32.mrf.mxu0 }
  0xe4   :  { %v552_v0 = vpop.f32.mrf.mxu1 }
  0xea   :  { %v2778_v4 = vpop.f32.mrf.mxu1 }
  0xeb   :  { %2807 = vmatprep.subr.mxu1 %v2778_v4  ;;  %v2767_v5 = vpop.f32.mrf.mxu0 }
  0xec   :  { %v702_v8 = vpop.f32.mrf.mxu1  ;;  %2808 = vmatpush3.msra.mxu1 %v2778_v4 }
  0xed   :  { %2809 = vmatprep.subr.mxu1 %v702_v8  ;;  %v627_v9 = vpop.f32.mrf.mxu0 }
  0xee   :  { %2810 = vmatpush3.msra.mxu1 %v702_v8 }
  0xef   :  { %2811 = vmatprep.subr.mxu1 %v2767_v5 }
  0xf0   :  { %2812 = vmatpush3.msra.mxu1 %v2767_v5 }
  0xf1   :  { %2813 = vmatprep.subr.mxu1 %v627_v9 }
  0xf2   :  { %2814 = vmatpush3.msra.mxu1 %v627_v9 }
  0xf3   :  { %2815 = vmatprep.subr.mxu1 %v2756_v62 }
  0xf4   :  { %2816 = vmatpush3.msra.mxu1 %v2756_v62 }
  0xf5   :  { %2817 = vmatprep.subr.mxu1 %v552_v0 }
  0xf6   :  { %2818 = vmatpush3.msra.mxu1 %v552_v0 }
  0xf7   :  { %2819 = vmatprep.subr.mxu1 %v2745_v63 }
  0xf8   :  { %2820 = vmatpush3.msra.mxu1 %v2745_v63 }
  0xf9   :  { %2821 = vmatprep.subr.mxu1 %v477_v1 }
  0xfa   :  { %2822 = vmatpush3.msra.mxu1 %v477_v1 }
 0x190   :  { %v2797_v10 = vpop.f32.mrf.mxu0 }
 0x191   :  { %v807_v15 = vadd.f32 %v2797_v10, %v83_v12 }
 0x192   :  { %v801_v13 = vpop.f32.mrf.mxu0 }
 0x193   :  { %v802_v14 = vadd.f32 %v801_v13, %v82_v11  ;;  %v844_v19 = vsel %vm840_vm1, %v807_v15, -inf }
 0x195   :  { %v841_v16 = vsel %vm840_vm1, %v802_v14, -inf }
 0x196   :  { %842 = vmax.xlane.f32.xlu0 %v841_v16 }
 0x198   :  { %v2800_v17 = vpop.f32.mrf.mxu0 }
 0x199   :  { %v817_v25 = vadd.f32 %v2800_v17, %v85_v20 }
 0x19a   :  { %845 = vmax.xlane.f32.xlu0 %v844_v19  ;;  %v811_v21 = vpop.f32.mrf.mxu0 }
 0x19b   :  { %v812_v22 = vadd.f32 %v811_v21, %v84_v18  ;;  %v850_v34 = vsel %vm840_vm1, %v817_v25, -inf }
 0x19c   :  { %v2803_v23 = vpop.f32.mrf.mxu0 }
 0x19d   :  { %v847_v26 = vsel %vm840_vm1, %v812_v22, -inf  ;;  %v827_v32 = vadd.f32 %v2803_v23, %v87_v27 }
 0x19e   :  { %v821_v28 = vpop.f32.mrf.mxu0  ;;  %848 = vmax.xlane.f32.xlu1 %v847_v26 }
 0x19f   :  { %v822_v29 = vadd.f32 %v821_v28, %v86_v24  ;;  %v856_v39 = vsel %vm840_vm1, %v827_v32, -inf }
 0x1a0   :  { %v2806_v30 = vpop.f32.mrf.mxu0 }
 0x1a1   :  { %v853_v33 = vsel %vm840_vm1, %v822_v29, -inf  ;;  %v837_v38 = vadd.f32 %v2806_v30, %v89_v35 }
 0x1a2   :  { %854 = vmax.xlane.f32.xlu0 %v853_v33  ;;  %851 = vmax.xlane.f32.xlu1 %v850_v34  ;;  %v831_v36 = vpop.f32.mrf.mxu0 }
 0x1a3   :  { %v832_v37 = vadd.f32 %v831_v36, %v88_v31  ;;  %v862_v41 = vsel %vm840_vm1, %v837_v38, -inf }
 0x1a5   :  { %v859_v40 = vsel %vm840_vm1, %v832_v37, -inf }
 0x1a6   :  { %857 = vmax.xlane.f32.xlu1 %v856_v39  ;;  %860 = vmax.xlane.f32.xlu0 %v859_v40 }
 0x1aa   :  { %863 = vmax.xlane.f32.xlu1 %v862_v41 }
 0x21f   :  { %v843_v42 = vpop.xlane.xlu0 %842 }
 0x220   :  { %v865_v43 = vsub.f32 %v802_v14, %v843_v42 }
 0x222   :  { %v873_v44 = vmul.f32 1.442695, %v865_v43 }
 0x223   :  { %v846_v45 = vpop.xlane.xlu0 %845 }
 0x224   :  { %3012 = vpow2.f32 %v873_v44  ;;  %v866_v46 = vsub.f32 %v807_v15, %v846_v45 }
 0x226   :  { %v875_v47 = vmul.f32 1.442695, %v866_v46  ;;  %v1058_v46 = vlaneseq }
 0x227   :  { %v849_v48 = vpop.xlane.xlu1 %848 }
 0x228   :  { %3014 = vpow2.f32 %v875_v47  ;;  %v867_v49 = vsub.f32 %v812_v22, %v849_v48  ;;  %v3427_v47 = vshrl.u32 %v1058_v46, 7 }
 0x22a   :  { %v877_v50 = vmul.f32 1.442695, %v867_v49  ;;  %v1060_v49 = vsub.s32 0, %v3427_v47 }
 0x22b   :  { %v855_v51 = vpop.xlane.xlu0 %854  ;;  %v852_v52 = vpop.xlane.xlu1 %851 }
 0x22c   :  { %3016 = vpow2.f32 %v877_v50  ;;  %v869_v53 = vsub.f32 %v822_v29, %v855_v51  ;;  %v868_v54 = vsub.f32 %v817_v25, %v852_v52  ;;  %v3433_v50 = vld [vmem:[%s3755_s4 + $0x240] sm:$0xff] }
 0x22d   :  { %v1061_v52 = vrot.slane %v3433_v50, %v1060_v49 }
 0x22e   :  { %v881_v55 = vmul.f32 1.442695, %v869_v53  ;;  %v879_v56 = vmul.f32 1.442695, %v868_v54 }
 0x22f   :  { %v858_v57 = vpop.xlane.xlu1 %857  ;;  %v861_v58 = vpop.xlane.xlu0 %860 }
 0x230   :  { %3018 = vpow2.f32 %v881_v55  ;;  %v870_v59 = vsub.f32 %v827_v32, %v858_v57  ;;  %v871_v60 = vsub.f32 %v832_v37, %v861_v58 }
 0x231   :  { %v3013_v61 = vpop.eup %3012  ;;  %3020 = vpow2.f32 %v879_v56 }
 0x232   :  { %v883_v62 = vmul.f32 1.442695, %v870_v59  ;;  %v885_v63 = vmul.f32 1.442695, %v871_v60  ;;  %v889_v0 = vsel %vm840_vm1, %v3013_v61, 0.0 }
 0x233   :  { %v864_v1 = vpop.xlane.xlu1 %863  ;;  %890 = vadd.xlane.f32.xlu0 %v889_v0 }
 0x234   :  { %3022 = vpow2.f32 %v883_v62  ;;  %v872_v4 = vsub.f32 %v837_v38, %v864_v1 }
 0x235   :  { %v3015_v5 = vpop.eup %3014  ;;  %3024 = vpow2.f32 %v885_v63 }
 0x236   :  { %v887_v8 = vmul.f32 1.442695, %v872_v4  ;;  %v892_v9 = vsel %vm840_vm1, %v3015_v5, 0.0 }
 0x237   :  { %893 = vadd.xlane.f32.xlu1 %v892_v9 }
 0x238   :  { %3026 = vpow2.f32 %v887_v8 }
 0x239   :  { %v3017_v10 = vpop.eup %3016 }
 0x23a   :  { %v895_v11 = vsel %vm840_vm1, %v3017_v10, 0.0 }
 0x23b   :  { %896 = vadd.xlane.f32.xlu0 %v895_v11 }
 0x23d   :  { %v3019_v12 = vpop.eup %3018 }
 0x23e   :  { %v3021_v13 = vpop.eup %3020  ;;  %v901_v14 = vsel %vm840_vm1, %v3019_v12, 0.0 }
 0x23f   :  { %v898_v15 = vsel %vm840_vm1, %v3021_v13, 0.0  ;;  %902 = vadd.xlane.f32.xlu0 %v901_v14 }
 0x240   :  { %899 = vadd.xlane.f32.xlu1 %v898_v15 }
 0x241   :  { %v3023_v16 = vpop.eup %3022 }
 0x242   :  { %v3025_v17 = vpop.eup %3024  ;;  %v904_v18 = vsel %vm840_vm1, %v3023_v16, 0.0 }
 0x243   :  { %v907_v19 = vsel %vm840_vm1, %v3025_v17, 0.0 }
 0x244   :  { %905 = vadd.xlane.f32.xlu1 %v904_v18  ;;  %908 = vadd.xlane.f32.xlu0 %v907_v19 }
 0x245   :  { %v3027_v20 = vpop.eup %3026 }
 0x246   :  { %v910_v21 = vsel %vm840_vm1, %v3027_v20, 0.0 }
 0x248   :  { %911 = vadd.xlane.f32.xlu1 %v910_v21  ;;  %v1126_v21 = vld [vmem:[%s3755_s4 + $0x158] sm:$0xff] }
 0x249   :  { %2857 = vmatprep.subr.mxu0 %v1126_v21 }
 0x24a   :  { %2858 = vmatpush3.msra.mxu0 %v1126_v21 }
 0x2bc   :  { %v891_v22 = vpop.xlane.xlu0 %890 }
 0x2bd   :  { %3028 = vrcp.f32 %v891_v22  ;;  %v1125_v22 = vld [vmem:[%s3755_s4 + $0x150] sm:$0xff] }
 0x2be   :  { %2859 = vmatprep.subr.mxu0 %v1125_v22 }
 0x2bf   :  { %2860 = vmatpush3.msra.mxu0 %v1125_v22 }
 0x2c0   :  { %v894_v23 = vpop.xlane.xlu1 %893 }
 0x2c1   :  { %3030 = vrcp.f32 %v894_v23  ;;  %v1116_v23 = vld [vmem:[%s3755_s4 + $0x108] sm:$0xff] }
 0x2c4   :  { %v897_v24 = vpop.xlane.xlu0 %896 }
 0x2c5   :  { %3032 = vrcp.f32 %v897_v24  ;;  %v1124_v24 = vld [vmem:[%s3755_s4 + $0x148] sm:$0xff] }
 0x2c6   :  { %2861 = vmatprep.subr.mxu0 %v1124_v24 }
 0x2c7   :  { %2862 = vmatpush3.msra.mxu0 %v1124_v24  ;;  %v1149_v24 = vld [vmem:[%s3755_s4 + $0x2a0] sm:$0xff] }
 0x2c8   :  { %v903_v25 = vpop.xlane.xlu0 %902 }
 0x2c9   :  { %v900_v26 = vpop.xlane.xlu1 %899  ;;  %3034 = vrcp.f32 %v903_v25  ;;  %v1115_v25 = vld [vmem:[%s3755_s4 + $0x100] sm:$0xff] }
 0x2ca   :  { %v3029_v27 = vpop.eup %3028  ;;  %3036 = vrcp.f32 %v900_v26  ;;  %v1123_v26 = vld [vmem:[%s3755_s4 + $0x140] sm:$0xff] }
 0x2cb   :  { %v921_v28 = vmul.f32 %v3029_v27, %v3013_v61  ;;  %2863 = vmatprep.subr.mxu0 %v1123_v26  ;;  %v1122_v27 = vld [vmem:[%s3755_s4 + $0x138] sm:$0xff] }
 0x2cc   :  { %2864 = vmatpush3.msra.mxu0 %v1123_v26  ;;  %v1151_v26 = vld [vmem:[%s3755_s4 + $0x2b0] sm:$0xff] }
 0x2cd   :  { %v906_v29 = vpop.xlane.xlu1 %905  ;;  %v909_v30 = vpop.xlane.xlu0 %908  ;;  %2823 = vmatprep.mubr.msk.f32.mxu1 %vm840_vm1, %v921_v28  ;;  %v1134_v28 = vld [vmem:[%s3755_s4 + $0x198] sm:$0xff] }
 0x2ce   :  { %v3031_v31 = vpop.eup %3030  ;;  %3038 = vrcp.f32 %v906_v29  ;;  %2879 = vmatprep.subr.mxu0 %v1134_v28 }
 0x2cf   :  { %3040 = vrcp.f32 %v909_v30  ;;  %v922_v32 = vmul.f32 %v3031_v31, %v3015_v5 }
 0x2d1   :  { %v912_v33 = vpop.xlane.xlu1 %911  ;;  %2824 = vmatmul.mubr.msk.f32.vlgmr.msra.gmra.mxu1 %vm840_vm1, %v922_v32 }
 0x2d2   :  { %v3033_v34 = vpop.eup %3032  ;;  %3042 = vrcp.f32 %v912_v33 }
 0x2d3   :  { %v923_v35 = vmul.f32 %v3033_v34, %v3017_v10 }
 0x2d5   :  { %2826 = vmatprep.mubr.msk.f32.mxu1 %vm840_vm1, %v923_v35  ;;  %v1101_v35 = vsub.s32 3, %v3427_v47 }
 0x2d6   :  { %v3035_v36 = vpop.eup %3034 }
 0x2d7   :  { %v3037_v37 = vpop.eup %3036  ;;  %v925_v38 = vmul.f32 %v3035_v36, %v3019_v12  ;;  %v1107_v36 = vsub.s32 4, %v3427_v47 }
 0x2d8   :  { %v924_v39 = vmul.f32 %v3037_v37, %v3021_v13  ;;  %v1102_v37 = vrot.slane %v3433_v50, %v1101_v35  ;;  %v1153_v35 = vld [vmem:[%s3755_s4 + $0x2c0] sm:$0xff] }
 0x2da   :  { %2827 = vmatmul.mubr.msk.f32.gmra.mxu1 %vm840_vm1, %v924_v39 }
 0x2db   :  { %v3039_v40 = vpop.eup %3038  ;;  %2829 = vmatprep.mubr.msk.f32.mxu1 %vm840_vm1, %v925_v38 }
 0x2dc   :  { %v3041_v41 = vpop.eup %3040  ;;  %v926_v42 = vmul.f32 %v3039_v40, %v3023_v16 }
 0x2dd   :  { %v927_v43 = vmul.f32 %v3041_v41, %v3025_v17  ;;  %v1108_v41 = vrot.slane %v3433_v50, %v1107_v36  ;;  %v1154_v36 = vld [vmem:[%s3755_s4 + $0x2c8] sm:$0xff] }
 0x2de   :  { %2830 = vmatmul.mubr.msk.f32.gmra.mxu1 %vm840_vm1, %v926_v42 }
 0x2df   :  { %v3043_v44 = vpop.eup %3042  ;;  %2832 = vmatprep.mubr.msk.f32.mxu1 %vm840_vm1, %v927_v43 }
 0x2e0   :  { %v928_v45 = vmul.f32 %v3043_v44, %v3027_v20  ;;  %v1117_v20 = vld [vmem:[%s3755_s4 + $0x110] sm:$0xff] }
 0x2e2   :  { %2833 = vmatmul.mubr.msk.f32.gmra.mxu1 %vm840_vm1, %v928_v45 }
 0x391   :  { %v2825_v48 = vpop.f32.mrf.mxu1 }
 0x392   :  { %v1063_v55 = vadd.f32 %v2825_v48, %v1061_v52 }
 0x393   :  { %v1019_v51 = vpop.f32.mrf.mxu1 }
 0x394   :  { %v1062_v57 = vadd.f32 %v1061_v52, %v1019_v51  ;;  %v1121_v52 = vld [vmem:[%s3755_s4 + $0x130] sm:$0xff] }
 0x39a   :  { %v2828_v53 = vpop.f32.mrf.mxu1 }
 0x39b   :  { %v1065_v58 = vadd.f32 %v2828_v53, %v1063_v55  ;;  %v1133_v53 = vld [vmem:[%s3755_s4 + $0x190] sm:$0xff]  ;;  %v1131_v55 = vld [vmem:[%s3755_s4 + $0x180] sm:$0xff] }
 0x39c   :  { %v1029_v54 = vpop.f32.mrf.mxu1 }
 0x39d   :  { %v1064_v60 = vadd.f32 %v1062_v57, %v1029_v54  ;;  %v1119_v54 = vld [vmem:[%s3755_s4 + $0x120] sm:$0xff]  ;;  %v1129_v57 = vld [vmem:[%s3755_s4 + $0x170] sm:$0xff] }
 0x39e   :  { %v2831_v56 = vpop.f32.mrf.mxu1 }
 0x39f   :  { %v1067_v61 = vadd.f32 %v2831_v56, %v1065_v58  ;;  %v1130_v56 = vld [vmem:[%s3755_s4 + $0x178] sm:$0xff]  ;;  %v1128_v58 = vld [vmem:[%s3755_s4 + $0x168] sm:$0xff] }
 0x3a0   :  { %v1039_v59 = vpop.f32.mrf.mxu1 }
 0x3a1   :  { %v1066_v63 = vadd.f32 %v1064_v60, %v1039_v59  ;;  %v1142_v59 = vld [vmem:[%s3755_s4 + $0x1d8] sm:$0xff]  ;;  %v34_v60 = vld [vmem:[%s3752_s1] sm:$0xff] }
 0x3a2   :  { %v2834_v62 = vpop.f32.mrf.mxu1 }
 0x3a3   :  { %v1069_v0 = vadd.f32 %v2834_v62, %v1067_v61  ;;  %v1127_v61 = vld [vmem:[%s3755_s4 + $0x160] sm:$0xff]  ;;  %v35_v62 = vld [vmem:[%s3752_s1 + $0x8] sm:$0xff] }
 0x3a4   :  { %v1049_v1 = vpop.f32.mrf.mxu1 }
 0x3a5   :  { %v1068_v4 = vadd.f32 %v1066_v63, %v1049_v1  ;;  %v1071_v5 = vadd.f32 %v1069_v0, %v3185_v6  ;;  %v1141_v63 = vld [vmem:[%s3755_s4 + $0x1d0] sm:$0xff]  ;;  %v1138_v0 = vld [vmem:[%s3755_s4 + $0x1b8] sm:$0xff] }
 0x3a6   :  { %v1137_v1 = vld [vmem:[%s3755_s4 + $0x1b0] sm:$0xff] }
 0x3a7   :  { %v1075_v8 = vsel %vm90_vm0, %v1071_v5, 0.0  ;;  %v1070_v9 = vadd.f32 %v1068_v4, %v3168_v2  ;;  %v1118_v2 = vld [vmem:[%s3755_s4 + $0x118] sm:$0xff]  ;;  %v1140_v4 = vld [vmem:[%s3755_s4 + $0x1c8] sm:$0xff] }
 0x3a8   :  { %1076 = vadd.xlane.f32.xlu1 %v1075_v8  ;;  %2835 = vmatprep.subr.mxu1 %v1118_v2  ;;  %v1139_v8 = vld [vmem:[%s3755_s4 + $0x1c0] sm:$0xff] }
 0x3a9   :  { %v1072_v10 = vsel %vm90_vm0, %v1070_v9, 0.0  ;;  %2836 = vmatpush3.msra.mxu1 %v1118_v2 }
 0x3aa   :  { %1073 = vadd.xlane.f32.xlu0 %v1072_v10  ;;  %2837 = vmatprep.subr.mxu1 %v1117_v20  ;;  %v39_v10 = vld [vmem:[%s3754_s3 + $0x8] sm:$0xff] }
 0x3ab   :  { %2838 = vmatpush3.msra.mxu1 %v1117_v20 }
 0x3ac   :  { %2839 = vmatprep.subr.mxu1 %v1116_v23 }
 0x3ad   :  { %2840 = vmatpush3.msra.mxu1 %v1116_v23 }
 0x3ae   :  { %2841 = vmatprep.subr.mxu1 %v1115_v25 }
 0x3af   :  { %2842 = vmatpush3.msra.mxu1 %v1115_v25  ;;  %v1150_v25 = vld [vmem:[%s3755_s4 + $0x2a8] sm:$0xff] }
 0x3b0   :  { %2846 = vmatprep.subr.mxu1 %v1122_v27 }
 0x431   :  { %v1077_v11 = vpop.xlane.xlu1 %1076 }
 0x432   :  { %v1080_v12 = vmul.f32 0.03125, %v1077_v11  ;;  %v1146_v11 = vld [vmem:[%s3755_s4 + $0x1f8] sm:$0xff] }
 0x433   :  { %v1074_v13 = vpop.xlane.xlu0 %1073 }
 0x434   :  { %v1082_v14 = vsub.f32 %v1071_v5, %v1080_v12  ;;  %v1079_v15 = vmul.f32 0.03125, %v1074_v13  ;;  %v1136_v5 = vld [vmem:[%s3755_s4 + $0x1a8] sm:$0xff]  ;;  %v38_v12 = vld [vmem:[%s3754_s3] sm:$0xff]  ;;  %v1114_v13 = vadd.f32 %v39_v10, %v35_v62 }
 0x436   :  { %v1081_v16 = vsub.f32 %v1070_v9, %v1079_v15  ;;  %v1084_v17 = vmul.f32 %v1082_v14, %v1082_v14  ;;  %v1135_v9 = vld [vmem:[%s3755_s4 + $0x1a0] sm:$0xff]  ;;  %v1113_v15 = vadd.f32 %v38_v12, %v34_v60  ;;  %v1162_v12 = vld [vmem:[%s3758_s7 + $0x38] sm:$0xff] }
 0x438   :  { %v1088_v18 = vsel %vm90_vm0, %v1084_v17, 0.0  ;;  %v1083_v19 = vmul.f32 %v1081_v16, %v1081_v16  ;;  %v1143_v17 = vld [vmem:[%s3755_s4 + $0x1e0] sm:$0xff] }
 0x439   :  { %1089 = vadd.xlane.f32.xlu1 %v1088_v18 }
 0x43a   :  { %v1085_v6 = vsel %vm90_vm0, %v1083_v19, 0.0  ;;  %v1147_v19 = vld [vmem:[%s3755_s4 + $0x290] sm:$0xff] }
 0x43b   :  { %1086 = vadd.xlane.f32.xlu0 %v1085_v6  ;;  %v1148_v6 = vld [vmem:[%s3755_s4 + $0x298] sm:$0xff] }
 0x4c2   :  { %v1090_v29 = vpop.xlane.xlu1 %1089 }
 0x4c3   :  { %v1092_v30 = vmul.f32 0.03125, %v1090_v29 }
 0x4c4   :  { %v1087_v31 = vpop.xlane.xlu0 %1086 }
 0x4c5   :  { %v1094_v32 = vadd.f32 1e-05, %v1092_v30  ;;  %v1091_v33 = vmul.f32 0.03125, %v1087_v31  ;;  %v1152_v31 = vld [vmem:[%s3755_s4 + $0x2b8] sm:$0xff] }
 0x4c7   :  { %3044 = vrsqrt.f32 %v1094_v32  ;;  %v1093_v34 = vadd.f32 1e-05, %v1091_v33 }
 0x4c9   :  { %3046 = vrsqrt.f32 %v1093_v34 }
 0x4d4   :  { %v3045_v38 = vpop.eup %3044 }
 0x4d5   :  { %v1098_v39 = vmul.f32 %v3045_v38, %v1082_v14  ;;  %v1145_v14 = vld [vmem:[%s3755_s4 + $0x1f0] sm:$0xff] }
 0x4d6   :  { %v3047_v40 = vpop.eup %3046 }
 0x4d7   :  { %v1097_v42 = vmul.f32 %v3047_v40, %v1081_v16  ;;  %v1104_v43 = vmul.f32 %v1102_v37, %v1098_v39  ;;  %v1144_v16 = vld [vmem:[%s3755_s4 + $0x1e8] sm:$0xff] }
 0x4d9   :  { %v1103_v44 = vmul.f32 %v1102_v37, %v1097_v42  ;;  %v3478_v45 = vadd.f32 %v1108_v41, %v1104_v43 }
 0x4db   :  { %v3480_v46 = vadd.f32 %v1108_v41, %v1103_v44  ;;  %v1112_v51 = vadd.f32 %v3478_v45, %v3190_v7  ;;  %v1132_v7 = vld [vmem:[%s3755_s4 + $0x188] sm:$0xff] }
 0x4dd   :  { %v1111_v48 = vadd.f32 %v3480_v46, %v3173_v3  ;;  %v1120_v3 = vld [vmem:[%s3755_s4 + $0x128] sm:$0xff] }
 0x4df   :  { %2843 = vmatprep.mubr.msk.f32.mxu1 %vm90_vm0, %v1111_v48  ;;  %2865 = vmatprep.mubr.msk.f32.mxu0 %vm90_vm0, %v1111_v48 }
 0x4e0   :  { %2844 = vmatmul.mubr.msk.f32.vlgmr.msra.gmra.mxu1 %vm90_vm0, %v1112_v51  ;;  %2866 = vmatmul.mubr.msk.f32.vlgmr.msra.gmra.mxu0 %vm90_vm0, %v1112_v51 }
 0x4e1   :  { %2847 = vmatpush3.msra.mxu1 %v1122_v27  ;;  %2854 = vmatprep.mubr.msk.f32.mxu1 %vm90_vm0, %v1111_v48 }
 0x4e2   :  { %2848 = vmatprep.subr.mxu1 %v1121_v52  ;;  %2880 = vmatpush3.msra.mxu0 %v1134_v28 }
 0x4e3   :  { %2849 = vmatpush3.msra.mxu1 %v1121_v52  ;;  %2881 = vmatprep.subr.mxu0 %v1133_v53 }
 0x4e4   :  { %2850 = vmatprep.subr.mxu1 %v1120_v3  ;;  %2882 = vmatpush3.msra.mxu0 %v1133_v53  ;;  %v1156_v53 = vld [vmem:[%s3758_s7 + $0x8] sm:$0xff] }
 0x4e5   :  { %2851 = vmatpush3.msra.mxu1 %v1120_v3  ;;  %2883 = vmatprep.subr.mxu0 %v1132_v7 }
 0x4e6   :  { %2852 = vmatprep.subr.mxu1 %v1119_v54  ;;  %2884 = vmatpush3.msra.mxu0 %v1132_v7  ;;  %v1155_v7 = vld [vmem:[%s3758_s7] sm:$0xff] }
 0x4e7   :  { %2853 = vmatpush3.msra.mxu1 %v1119_v54  ;;  %2885 = vmatprep.subr.mxu0 %v1131_v55 }
 0x4e8   :  { %2855 = vmatmul.mubr.msk.f32.vlgmr.msra.gmra.mxu1 %vm90_vm0, %v1112_v51  ;;  %2868 = vmatprep.subr.mxu1 %v1130_v56 }
 0x4e9   :  { %2869 = vmatpush3.msra.mxu1 %v1130_v56  ;;  %2876 = vmatprep.mubr.msk.f32.mxu1 %vm90_vm0, %v1111_v48 }
 0x4ea   :  { %2870 = vmatprep.subr.mxu1 %v1129_v57  ;;  %2886 = vmatpush3.msra.mxu0 %v1131_v55 }
 0x4eb   :  { %2871 = vmatpush3.msra.mxu1 %v1129_v57  ;;  %2887 = vmatprep.mubr.msk.f32.mxu0 %vm90_vm0, %v34_v60 }
 0x4ec   :  { %2872 = vmatprep.subr.mxu1 %v1128_v58  ;;  %2901 = vmatprep.subr.mxu0 %v1142_v59 }
 0x4ed   :  { %2873 = vmatpush3.msra.mxu1 %v1128_v58  ;;  %2888 = vmatmul.mubr.msk.f32.vlgmr.msra.gmra.mxu0 %vm90_vm0, %v35_v62 }
 0x4ee   :  { %2874 = vmatprep.subr.mxu1 %v1127_v61  ;;  %2902 = vmatpush3.msra.mxu0 %v1142_v59  ;;  %v1158_v59 = vld [vmem:[%s3758_s7 + $0x18] sm:$0xff] }
 0x4ef   :  { %2875 = vmatpush3.msra.mxu1 %v1127_v61  ;;  %2903 = vmatprep.subr.mxu0 %v1141_v63  ;;  %v1157_v61 = vld [vmem:[%s3758_s7 + $0x10] sm:$0xff] }
 0x4f0   :  { %2877 = vmatmul.mubr.msk.f32.vlgmr.msra.gmra.mxu1 %vm90_vm0, %v1112_v51  ;;  %2890 = vmatprep.subr.mxu1 %v1138_v0 }
 0x4f1   :  { %2891 = vmatpush3.msra.mxu1 %v1138_v0  ;;  %2898 = vmatprep.mubr.msk.f32.mxu1 %vm90_vm0, %v34_v60  ;;  %v1160_v0 = vld [vmem:[%s3758_s7 + $0x28] sm:$0xff] }
 0x4f2   :  { %2892 = vmatprep.subr.mxu1 %v1137_v1  ;;  %2904 = vmatpush3.msra.mxu0 %v1141_v63 }
 0x4f3   :  { %2893 = vmatpush3.msra.mxu1 %v1137_v1  ;;  %2905 = vmatprep.subr.mxu0 %v1140_v4 }
 0x4f4   :  { %2894 = vmatprep.subr.mxu1 %v1136_v5  ;;  %2906 = vmatpush3.msra.mxu0 %v1140_v4 }
 0x4f5   :  { %2895 = vmatpush3.msra.mxu1 %v1136_v5  ;;  %2907 = vmatprep.subr.mxu0 %v1139_v8 }
 0x4f6   :  { %2896 = vmatprep.subr.mxu1 %v1135_v9  ;;  %2908 = vmatpush3.msra.mxu0 %v1139_v8  ;;  %v1159_v8 = vld [vmem:[%s3758_s7 + $0x20] sm:$0xff] }
 0x4f7   :  { %2897 = vmatpush3.msra.mxu1 %v1135_v9  ;;  %2909 = vmatprep.mubr.msk.f32.mxu0 %vm90_vm0, %v34_v60 }
 0x4f8   :  { %2912 = vmatprep.subr.mxu1 %v1146_v11  ;;  %2899 = vmatmul.mubr.msk.f32.vlgmr.msra.gmra.mxu1 %vm90_vm0, %v35_v62 }
 0x4f9   :  { %2913 = vmatpush3.msra.mxu1 %v1146_v11  ;;  %2920 = vmatprep.mubr.msk.f32.mxu1 %vm90_vm0, %v34_v60 }
 0x4fa   :  { %2914 = vmatprep.subr.mxu1 %v1145_v14  ;;  %2910 = vmatmul.mubr.msk.f32.vlgmr.msra.gmra.mxu0 %vm90_vm0, %v35_v62 }
 0x4fb   :  { %2915 = vmatpush3.msra.mxu1 %v1145_v14  ;;  %2923 = vmatprep.subr.msk.mxu0 %vm90_vm0, %v1114_v13 }
 0x4fc   :  { %2916 = vmatprep.subr.mxu1 %v1144_v16  ;;  %2924 = vmatpush3.xpose.msk.msra.mxu0 %vm90_vm0, %v1114_v13 }
 0x4fd   :  { %2917 = vmatpush3.msra.mxu1 %v1144_v16  ;;  %2925 = vmatprep.subr.msk.mxu0 %vm90_vm0, %v1113_v15  ;;  %v1161_v16 = vld [vmem:[%s3758_s7 + $0x30] sm:$0xff] }
 0x4fe   :  { %2918 = vmatprep.subr.mxu1 %v1143_v17 }
 0x4ff   :  { %2919 = vmatpush3.msra.mxu1 %v1143_v17 }
 0x500   :  { %2921 = vmatmul.mubr.msk.f32.vlgmr.msra.gmra.mxu1 %vm90_vm0, %v35_v62  ;;  %2926 = vmatpush3.xpose.msk.msra.mxu0 %vm90_vm0, %v1113_v15 }
 0x501   :  { %2927 = vmatprep.subr.msk.mxu0 %vm90_vm0, %v1114_v13 }
 0x504   :  { %2928 = vmatpush3.xpose.msk.msra.mxu0 %vm90_vm0, %v1114_v13 }
 0x505   :  { %2929 = vmatprep.subr.msk.mxu0 %vm90_vm0, %v1113_v15 }
 0x508   :  { %2930 = vmatpush3.xpose.msk.msra.mxu0 %vm90_vm0, %v1113_v15 }
 0x509   :  { %2931 = vmatprep.subr.msk.mxu0 %vm90_vm0, %v1114_v13 }
 0x50c   :  { %2932 = vmatpush3.xpose.msk.msra.mxu0 %vm90_vm0, %v1114_v13 }
 0x50d   :  { %2933 = vmatprep.subr.msk.mxu0 %vm90_vm0, %v1113_v15 }
 0x510   :  { %2934 = vmatpush3.xpose.msk.msra.mxu0 %vm90_vm0, %v1113_v15 }
 0x511   :  { %2935 = vmatprep.subr.msk.mxu0 %vm90_vm0, %v1114_v13 }
 0x514   :  { %2936 = vmatpush3.xpose.msk.msra.mxu0 %vm90_vm0, %v1114_v13 }
 0x515   :  { %2937 = vmatprep.subr.msk.mxu0 %vm90_vm0, %v1113_v15 }
 0x518   :  { %2938 = vmatpush3.xpose.msk.msra.mxu0 %vm90_vm0, %v1113_v15 }
 0x5a0   :  { %v2845_v18 = vpop.f32.mrf.mxu1  ;;  %v2867_v22 = vpop.f32.mrf.mxu0 }
 0x5a1   :  { %v1470_v21 = vadd.f32 %v2845_v18, %v1148_v6  ;;  %v1474_v33 = vadd.f32 %v2867_v22, %v1152_v31 }
 0x5a2   :  { %v1235_v2 = vpop.f32.mrf.mxu1  ;;  %v1385_v27 = vpop.f32.mrf.mxu0 }
 0x5a3   :  { %v1469_v20 = vadd.f32 %v1235_v2, %v1147_v19  ;;  %v1473_v32 = vadd.f32 %v1385_v27, %v1151_v26 }
 0x5a5   :  { %2939 = vmatprep.mubr.msk.f32.mxu0 %vm90_vm0, %v1469_v20 }
 0x5a6   :  { %2940 = vmatmul.mubr.msk.f32.vlgmr.msra.gmra.mxu0 %vm90_vm0, %v1470_v21 }
 0x5a8   :  { %v2856_v23 = vpop.f32.mrf.mxu1 }
 0x5a9   :  { %v1472_v30 = vadd.f32 %v2856_v23, %v1150_v25 }
 0x5aa   :  { %v1310_v28 = vpop.f32.mrf.mxu1 }
 0x5ab   :  { %v1471_v29 = vadd.f32 %v1310_v28, %v1149_v24 }
 0x5ad   :  { %2942 = vmatprep.mubr.msk.f32.mxu0 %vm90_vm0, %v1471_v29  ;;  %v2889_v41 = vpop.f32.mrf.mxu0 }
 0x5ae   :  { %2943 = vmatmul.mubr.msk.f32.gmra.mxu0 %vm90_vm0, %v1472_v30 }
 0x5af   :  { %2945 = vmatprep.mubr.msk.f32.mxu0 %vm90_vm0, %v1473_v32  ;;  %v1549_v43 = vpop.f32.mrf.mxu0 }
 0x5b0   :  { %v2878_v34 = vpop.f32.mrf.mxu1 }
 0x5b1   :  { %v1476_v39 = vadd.f32 %v2878_v34, %v1154_v36 }
 0x5b2   :  { %v1460_v37 = vpop.f32.mrf.mxu1  ;;  %2946 = vmatmul.mubr.msk.f32.gmra.mxu0 %vm90_vm0, %v1474_v33 }
 0x5b3   :  { %v1475_v38 = vadd.f32 %v1460_v37, %v1153_v35 }
 0x5b5   :  { %2948 = vmatprep.mubr.msk.f32.mxu0 %vm90_vm0, %v1475_v38 }
 0x5b6   :  { %2949 = vmatmul.mubr.msk.f32.gmra.mxu0 %vm90_vm0, %v1476_v39 }
 0x5b8   :  { %v2900_v40 = vpop.f32.mrf.mxu1 }
 0x5ba   :  { %v1624_v42 = vpop.f32.mrf.mxu1  ;;  %v2911_v48 = vpop.f32.mrf.mxu0 }
 0x5bc   :  { %v1699_v52 = vpop.f32.mrf.mxu0 }
 0x5c0   :  { %v2922_v44 = vpop.f32.mrf.mxu1 }
 0x5c1   :  { %2951 = vmatprep.subr.mxu1 %v2922_v44 }
 0x5c2   :  { %v1774_v51 = vpop.f32.mrf.mxu1  ;;  %2952 = vmatpush3.msra.mxu1 %v2922_v44 }
 0x5c3   :  { %2953 = vmatprep.subr.mxu1 %v1774_v51 }
 0x5c4   :  { %2954 = vmatpush3.msra.mxu1 %v1774_v51 }
 0x5c5   :  { %2955 = vmatprep.subr.mxu1 %v2911_v48 }
 0x5c6   :  { %2956 = vmatpush3.msra.mxu1 %v2911_v48 }
 0x5c7   :  { %2957 = vmatprep.subr.mxu1 %v1699_v52 }
 0x5c8   :  { %2958 = vmatpush3.msra.mxu1 %v1699_v52 }
 0x5c9   :  { %2959 = vmatprep.subr.mxu1 %v2900_v40 }
 0x5ca   :  { %2960 = vmatpush3.msra.mxu1 %v2900_v40 }
 0x5cb   :  { %2961 = vmatprep.subr.mxu1 %v1624_v42 }
 0x5cc   :  { %2962 = vmatpush3.msra.mxu1 %v1624_v42 }
 0x5cd   :  { %2963 = vmatprep.subr.mxu1 %v2889_v41 }
 0x5ce   :  { %2964 = vmatpush3.msra.mxu1 %v2889_v41 }
 0x5cf   :  { %2965 = vmatprep.subr.mxu1 %v1549_v43 }
 0x5d0   :  { %2966 = vmatpush3.msra.mxu1 %v1549_v43 }
 0x666   :  { %v2941_v3 = vpop.f32.mrf.mxu0 }
 0x667   :  { %v1885_v54 = vadd.f32 %v2941_v3, %v1156_v53 }
 0x668   :  { %v1879_v55 = vpop.f32.mrf.mxu0 }
 0x669   :  { %v1880_v56 = vadd.f32 %v1879_v55, %v1155_v7  ;;  %v1921_v57 = vsel %vm840_vm1, %v1885_v54, -inf }
 0x66a   :  { %1922 = vmax.xlane.f32.xlu1 %v1921_v57 }
 0x66b   :  { %v1918_v58 = vsel %vm840_vm1, %v1880_v56, -inf }
 0x66c   :  { %1919 = vmax.xlane.f32.xlu0 %v1918_v58 }
 0x66e   :  { %v2944_v60 = vpop.f32.mrf.mxu0 }
 0x66f   :  { %v1895_v62 = vadd.f32 %v2944_v60, %v1158_v59 }
 0x670   :  { %v1889_v63 = vpop.f32.mrf.mxu0 }
 0x671   :  { %v1890_v1 = vadd.f32 %v1889_v63, %v1157_v61  ;;  %v1927_v4 = vsel %vm840_vm1, %v1895_v62, -inf }
 0x672   :  { %1928 = vmax.xlane.f32.xlu1 %v1927_v4  ;;  %v2947_v5 = vpop.f32.mrf.mxu0 }
 0x673   :  { %v1905_v9 = vadd.f32 %v2947_v5, %v1160_v0  ;;  %v1924_v10 = vsel %vm840_vm1, %v1890_v1, -inf }
 0x674   :  { %v1899_v11 = vpop.f32.mrf.mxu0  ;;  %1925 = vmax.xlane.f32.xlu0 %v1924_v10 }
 0x675   :  { %v1900_v13 = vadd.f32 %v1899_v11, %v1159_v8  ;;  %v1933_v14 = vsel %vm840_vm1, %v1905_v9, -inf }
 0x676   :  { %1934 = vmax.xlane.f32.xlu1 %v1933_v14  ;;  %v2950_v15 = vpop.f32.mrf.mxu0 }
 0x677   :  { %v1915_v17 = vadd.f32 %v2950_v15, %v1162_v12  ;;  %v1930_v18 = vsel %vm840_vm1, %v1900_v13, -inf }
 0x678   :  { %1931 = vmax.xlane.f32.xlu0 %v1930_v18  ;;  %v1909_v19 = vpop.f32.mrf.mxu0 }
 0x679   :  { %v1910_v6 = vadd.f32 %v1909_v19, %v1161_v16  ;;  %v1939_v2 = vsel %vm840_vm1, %v1915_v17, -inf }
 0x67a   :  { %1940 = vmax.xlane.f32.xlu1 %v1939_v2 }
 0x67b   :  { %v1936_v20 = vsel %vm840_vm1, %v1910_v6, -inf }
 0x67c   :  { %1937 = vmax.xlane.f32.xlu0 %v1936_v20 }
 0x6f3   :  { %v1923_v21 = vpop.xlane.xlu1 %1922 }
 0x6f4   :  { %v1943_v22 = vsub.f32 %v1885_v54, %v1923_v21 }
 0x6f5   :  { %v1920_v23 = vpop.xlane.xlu0 %1919 }
 0x6f6   :  { %v1952_v24 = vmul.f32 1.442695, %v1943_v22  ;;  %v1942_v25 = vsub.f32 %v1880_v56, %v1920_v23 }
 0x6f8   :  { %3048 = vpow2.f32 %v1952_v24  ;;  %v1950_v26 = vmul.f32 1.442695, %v1942_v25 }
 0x6fa   :  { %3050 = vpow2.f32 %v1950_v26 }
 0x6fb   :  { %v1929_v27 = vpop.xlane.xlu1 %1928 }
 0x6fc   :  { %v1945_v28 = vsub.f32 %v1895_v62, %v1929_v27  ;;  %v2137_v27 = vsub.s32 1, %v3427_v47 }
 0x6fd   :  { %v1926_v29 = vpop.xlane.xlu0 %1925 }
 0x6fe   :  { %v1956_v30 = vmul.f32 1.442695, %v1945_v28  ;;  %v1944_v31 = vsub.f32 %v1890_v1, %v1926_v29  ;;  %v2138_v29 = vrot.slane %v3433_v50, %v2137_v27  ;;  %v2510_v27 = vld [vmem:[%s3756_s5 + $0x20] ss:$0 sm:$0xff] }
 0x6ff   :  { %v1935_v32 = vpop.xlane.xlu1 %1934 }
 0x700   :  { %3052 = vpow2.f32 %v1956_v30  ;;  %v1954_v33 = vmul.f32 1.442695, %v1944_v31  ;;  %v1947_v34 = vsub.f32 %v1905_v9, %v1935_v32 }
 0x701   :  { %v1932_v35 = vpop.xlane.xlu0 %1931 }
 0x702   :  { %3054 = vpow2.f32 %v1954_v33  ;;  %v1960_v36 = vmul.f32 1.442695, %v1947_v34  ;;  %v1946_v37 = vsub.f32 %v1900_v13, %v1932_v35 }
 0x703   :  { %v1941_v38 = vpop.xlane.xlu1 %1940 }
 0x704   :  { %3056 = vpow2.f32 %v1960_v36  ;;  %v1958_v39 = vmul.f32 1.442695, %v1946_v37  ;;  %v1949_v40 = vsub.f32 %v1915_v17, %v1941_v38 }
 0x705   :  { %v3049_v41 = vpop.eup %3048  ;;  %v1938_v42 = vpop.xlane.xlu0 %1937 }
 0x706   :  { %3058 = vpow2.f32 %v1958_v39  ;;  %v1964_v43 = vmul.f32 1.442695, %v1949_v40  ;;  %v1948_v44 = vsub.f32 %v1910_v6, %v1938_v42  ;;  %v1969_v48 = vsel %vm840_vm1, %v3049_v41, 0.0 }
 0x707   :  { %v3051_v51 = vpop.eup %3050  ;;  %1970 = vadd.xlane.f32.xlu1 %v1969_v48 }
 0x708   :  { %3060 = vpow2.f32 %v1964_v43  ;;  %v1962_v52 = vmul.f32 1.442695, %v1948_v44  ;;  %v1966_v53 = vsel %vm840_vm1, %v3051_v51, 0.0 }
 0x709   :  { %1967 = vadd.xlane.f32.xlu0 %v1966_v53 }
 0x70a   :  { %3062 = vpow2.f32 %v1962_v52 }
 0x70d   :  { %v3053_v3 = vpop.eup %3052 }
 0x70e   :  { %v1975_v7 = vsel %vm840_vm1, %v3053_v3, 0.0 }
 0x70f   :  { %v3055_v54 = vpop.eup %3054  ;;  %1976 = vadd.xlane.f32.xlu1 %v1975_v7 }
 0x710   :  { %v1972_v55 = vsel %vm840_vm1, %v3055_v54, 0.0 }
 0x711   :  { %v3057_v56 = vpop.eup %3056  ;;  %1973 = vadd.xlane.f32.xlu0 %v1972_v55 }
 0x712   :  { %v1981_v57 = vsel %vm840_vm1, %v3057_v56, 0.0 }
 0x713   :  { %v3059_v58 = vpop.eup %3058  ;;  %1982 = vadd.xlane.f32.xlu1 %v1981_v57 }
 0x714   :  { %v1978_v59 = vsel %vm840_vm1, %v3059_v58, 0.0 }
 0x715   :  { %v3061_v60 = vpop.eup %3060  ;;  %1979 = vadd.xlane.f32.xlu0 %v1978_v59 }
 0x716   :  { %v1987_v61 = vsel %vm840_vm1, %v3061_v60, 0.0 }
 0x717   :  { %v3063_v62 = vpop.eup %3062  ;;  %1988 = vadd.xlane.f32.xlu1 %v1987_v61  ;;  %v2188_v61 = vld [vmem:[%s3756_s5 + $0x8] sm:$0xff] }
 0x718   :  { %v1984_v63 = vsel %vm840_vm1, %v3063_v62, 0.0 }
 0x719   :  { %1985 = vadd.xlane.f32.xlu0 %v1984_v63  ;;  %v2286_v63 = vld [vmem:[%s3755_s4 + $0x238] sm:$0xff] }
 0x71a   :  { %2990 = vmatprep.subr.mxu0 %v2286_v63 }
 0x71b   :  { %2991 = vmatpush3.msra.mxu0 %v2286_v63 }
 0x790   :  { %v1971_v0 = vpop.xlane.xlu1 %1970 }
 0x791   :  { %3064 = vrcp.f32 %v1971_v0  ;;  %v2285_v0 = vld [vmem:[%s3755_s4 + $0x230] sm:$0xff] }
 0x792   :  { %v1968_v1 = vpop.xlane.xlu0 %1967  ;;  %2992 = vmatprep.subr.mxu0 %v2285_v0 }
 0x793   :  { %3066 = vrcp.f32 %v1968_v1  ;;  %v2284_v1 = vld [vmem:[%s3755_s4 + $0x228] sm:$0xff]  ;;  %2993 = vmatpush3.msra.mxu0 %v2285_v0 }
 0x794   :  { %2994 = vmatprep.subr.mxu0 %v2284_v1 }
 0x795   :  { %2995 = vmatpush3.msra.mxu0 %v2284_v1 }
 0x798   :  { %v1977_v4 = vpop.xlane.xlu1 %1976 }
 0x799   :  { %3068 = vrcp.f32 %v1977_v4  ;;  %v2283_v4 = vld [vmem:[%s3755_s4 + $0x220] sm:$0xff] }
 0x79a   :  { %v1974_v5 = vpop.xlane.xlu0 %1973  ;;  %2996 = vmatprep.subr.mxu0 %v2283_v4 }
 0x79b   :  { %3070 = vrcp.f32 %v1974_v5  ;;  %v2282_v5 = vld [vmem:[%s3755_s4 + $0x218] sm:$0xff]  ;;  %2997 = vmatpush3.msra.mxu0 %v2283_v4 }
 0x79c   :  { %v1983_v8 = vpop.xlane.xlu1 %1982  ;;  %2998 = vmatprep.subr.mxu0 %v2282_v5 }
 0x79d   :  { %3072 = vrcp.f32 %v1983_v8  ;;  %2999 = vmatpush3.msra.mxu0 %v2282_v5 }
 0x79e   :  { %v1980_v9 = vpop.xlane.xlu0 %1979  ;;  %v3065_v10 = vpop.eup %3064 }
 0x79f   :  { %3074 = vrcp.f32 %v1980_v9  ;;  %v1999_v15 = vmul.f32 %v3065_v10, %v3049_v41 }
 0x7a0   :  { %v3067_v11 = vpop.eup %3066  ;;  %v1989_v12 = vpop.xlane.xlu1 %1988 }
 0x7a1   :  { %v1998_v13 = vmul.f32 %v3067_v11, %v3051_v51  ;;  %3076 = vrcp.f32 %v1989_v12 }
 0x7a2   :  { %v1986_v14 = vpop.xlane.xlu0 %1985 }
 0x7a3   :  { %3078 = vrcp.f32 %v1986_v14  ;;  %2967 = vmatprep.mubr.msk.f32.mxu1 %vm840_vm1, %v1998_v13  ;;  %v2177_v14 = vsub.s32 5, %v3427_v47 }
 0x7a4   :  { %2968 = vmatmul.mubr.msk.f32.vlgmr.msra.gmra.mxu1 %vm840_vm1, %v1999_v15 }
 0x7a6   :  { %v3069_v16 = vpop.eup %3068 }
 0x7a7   :  { %v2001_v19 = vmul.f32 %v3069_v16, %v3053_v3  ;;  %v2178_v16 = vrot.slane %v3433_v50, %v2177_v14 }
 0x7a8   :  { %v3071_v17 = vpop.eup %3070 }
 0x7a9   :  { %v2000_v18 = vmul.f32 %v3071_v17, %v3055_v54  ;;  %v2183_v17 = vsub.s32 6, %v3427_v47 }
 0x7aa   :  { %v3073_v6 = vpop.eup %3072 }
 0x7ab   :  { %2970 = vmatprep.mubr.msk.f32.mxu1 %vm840_vm1, %v2000_v18  ;;  %v2003_v21 = vmul.f32 %v3073_v6, %v3057_v56 }
 0x7ac   :  { %v3075_v2 = vpop.eup %3074  ;;  %2971 = vmatmul.mubr.msk.f32.gmra.mxu1 %vm840_vm1, %v2001_v19 }
 0x7ad   :  { %v2002_v20 = vmul.f32 %v3075_v2, %v3059_v58 }
 0x7ae   :  { %v3077_v22 = vpop.eup %3076 }
 0x7af   :  { %2973 = vmatprep.mubr.msk.f32.mxu1 %vm840_vm1, %v2002_v20  ;;  %v2005_v25 = vmul.f32 %v3077_v22, %v3061_v60  ;;  %v2189_v60 = vld [vmem:[%s3756_s5 + $0x10] sm:$0xff]  ;;  %v2184_v20 = vrot.slane %v3433_v50, %v2183_v17 }
 0x7b0   :  { %v3079_v23 = vpop.eup %3078  ;;  %2974 = vmatmul.mubr.msk.f32.gmra.mxu1 %vm840_vm1, %v2003_v21 }
 0x7b1   :  { %v2004_v24 = vmul.f32 %v3079_v23, %v3063_v62  ;;  %v2187_v62 = vld [vmem:[%s3756_s5] sm:$0xff] }
 0x7b3   :  { %2976 = vmatprep.mubr.msk.f32.mxu1 %vm840_vm1, %v2004_v24  ;;  %v2281_v24 = vld [vmem:[%s3755_s4 + $0x210] sm:$0xff] }
 0x7b4   :  { %2977 = vmatmul.mubr.msk.f32.gmra.mxu1 %vm840_vm1, %v2005_v25  ;;  %3000 = vmatprep.subr.mxu0 %v2281_v24  ;;  %v2280_v25 = vld [vmem:[%s3755_s4 + $0x208] sm:$0xff] }
 0x7b5   :  { %3001 = vmatpush3.msra.mxu0 %v2281_v24 }
 0x7b6   :  { %3002 = vmatprep.subr.mxu0 %v2280_v25 }
 0x7b7   :  { %3003 = vmatpush3.msra.mxu0 %v2280_v25 }
 0x864   :  { %v2969_v26 = vpop.f32.mrf.mxu1 }
 0x865   :  { %v2140_v32 = vadd.f32 %v2969_v26, %v2138_v29  ;;  %v2279_v26 = vld [vmem:[%s3755_s4 + $0x200] sm:$0xff] }
 0x866   :  { %v2096_v28 = vpop.f32.mrf.mxu1  ;;  %3004 = vmatprep.subr.mxu0 %v2279_v26 }
 0x867   :  { %v2139_v34 = vadd.f32 %v2138_v29, %v2096_v28  ;;  %3005 = vmatpush3.msra.mxu0 %v2279_v26 }
 0x86c   :  { %v2972_v30 = vpop.f32.mrf.mxu1 }
 0x86d   :  { %v2142_v35 = vadd.f32 %v2972_v30, %v2140_v32 }
 0x86e   :  { %v2106_v31 = vpop.f32.mrf.mxu1 }
 0x86f   :  { %v2141_v37 = vadd.f32 %v2139_v34, %v2106_v31  ;;  %v2289_v34 = vsub.s32 2, %v3427_v47 }
 0x870   :  { %v2975_v33 = vpop.f32.mrf.mxu1 }
 0x871   :  { %v2144_v38 = vadd.f32 %v2975_v33, %v2142_v35  ;;  %v2290_v35 = vrot.slane %v3433_v50, %v2289_v34 }
 0x872   :  { %v2116_v36 = vpop.f32.mrf.mxu1 }
 0x873   :  { %v2143_v40 = vadd.f32 %v2141_v37, %v2116_v36 }
 0x874   :  { %v2978_v39 = vpop.f32.mrf.mxu1 }
 0x875   :  { %v2146_v41 = vadd.f32 %v2978_v39, %v2144_v38 }
 0x876   :  { %v2126_v42 = vpop.f32.mrf.mxu1 }
 0x877   :  { %v2145_v43 = vadd.f32 %v2143_v40, %v2126_v42  ;;  %v2148_v44 = vadd.f32 %v2146_v41, %v3478_v45 }
 0x879   :  { %v2152_v48 = vsel %vm90_vm0, %v2148_v44, 0.0  ;;  %v2147_v51 = vadd.f32 %v2145_v43, %v3480_v46  ;;  %v2190_v46 = vld [vmem:[%s3756_s5 + $0x18] sm:$0xff] }
 0x87a   :  { %2153 = vadd.xlane.f32.xlu1 %v2152_v48  ;;  %2979 = vmatprep.subr.mxu1 %v2190_v46 }
 0x87b   :  { %v2149_v52 = vsel %vm90_vm0, %v2147_v51, 0.0  ;;  %2980 = vmatpush3.msra.mxu1 %v2190_v46 }
 0x87c   :  { %2150 = vadd.xlane.f32.xlu0 %v2149_v52  ;;  %2981 = vmatprep.subr.mxu1 %v2189_v60 }
 0x87d   :  { %2982 = vmatpush3.msra.mxu1 %v2189_v60  ;;  %v2402_v60 = vsub.s32 7, %v3427_v47 }
 0x87e   :  { %2983 = vmatprep.subr.mxu1 %v2188_v61 }
 0x87f   :  { %2984 = vmatpush3.msra.mxu1 %v2188_v61  ;;  %v31_v61 = vld [vmem:[%s3755_s4 + $0x248] sm:$0xff] }
 0x880   :  { %2985 = vmatprep.subr.mxu1 %v2187_v62  ;;  %v2409_v1 = vrot.slane %v31_v61, %v1060_v49 }
 0x881   :  { %2986 = vmatpush3.msra.mxu1 %v2187_v62  ;;  %v3088_v62 = vld [vmem:[%s3755_s4 + $0x240] sm:$0xff]  ;;  %s3089_s4 = scalar_lea.vmem %s2420_s15, 256 }
 0x882   :  { %v2403_v63 = vrot.slane %v3088_v62, %v2402_v60  ;;  %p3090_p0 = scmp.ne.s32.totalorder %s2420_s15, %s3089_s4  ;;  %p3095_p2 = scmp.lt.s32.totalorder %s3089_s4, %s3089_s4 }
 0x884   :  { %p3096_p3 = por %p3095_p2, %p3094_p1 }
 0x886   :  { %p3097_p4 = pnand %p3096_p3, %p3090_p0 }
 0x903   :  { %v2154_v53 = vpop.xlane.xlu1 %2153 }
 0x904   :  { %v2156_v3 = vmul.f32 0.03125, %v2154_v53 }
 0x905   :  { %v2151_v7 = vpop.xlane.xlu0 %2150 }
 0x906   :  { %v2158_v54 = vsub.f32 %v2148_v44, %v2156_v3  ;;  %v2155_v55 = vmul.f32 0.03125, %v2151_v7 }
 0x908   :  { %v2157_v56 = vsub.f32 %v2147_v51, %v2155_v55  ;;  %v2160_v57 = vmul.f32 %v2158_v54, %v2158_v54 }
 0x90a   :  { %v2164_v58 = vsel %vm90_vm0, %v2160_v57, 0.0  ;;  %v2159_v59 = vmul.f32 %v2157_v56, %v2157_v56 }
 0x90b   :  { %2165 = vadd.xlane.f32.xlu1 %v2164_v58 }
 0x90c   :  { %v2161_v45 = vsel %vm90_vm0, %v2159_v59, 0.0 }
 0x90d   :  { %2162 = vadd.xlane.f32.xlu0 %v2161_v45 }
 0x994   :  { %v2166_v8 = vpop.xlane.xlu1 %2165 }
 0x995   :  { %v2168_v9 = vmul.f32 0.03125, %v2166_v8 }
 0x996   :  { %v2163_v10 = vpop.xlane.xlu0 %2162 }
 0x997   :  { %v2170_v11 = vadd.f32 1e-05, %v2168_v9  ;;  %v2167_v12 = vmul.f32 0.03125, %v2163_v10 }
 0x999   :  { %3080 = vrsqrt.f32 %v2170_v11  ;;  %v2169_v13 = vadd.f32 1e-05, %v2167_v12 }
 0x99b   :  { %3082 = vrsqrt.f32 %v2169_v13 }
 0x9a6   :  { %v3081_v15 = vpop.eup %3080 }
 0x9a7   :  { %v2174_v18 = vmul.f32 %v3081_v15, %v2158_v54 }
 0x9a8   :  { %v3083_v19 = vpop.eup %3082 }
 0x9a9   :  { %v2173_v6 = vmul.f32 %v3083_v19, %v2157_v56  ;;  %v2180_v2 = vmul.f32 %v2178_v16, %v2174_v18 }
 0x9ab   :  { %v2179_v21 = vmul.f32 %v2178_v16, %v2173_v6  ;;  %v2186_v23 = vadd.f32 %v2184_v20, %v2180_v2 }
 0x9ad   :  { %v2185_v22 = vadd.f32 %v2184_v20, %v2179_v21 }
 0x9af   :  { %2987 = vmatprep.mubr.msk.f32.mxu1 %vm90_vm0, %v2185_v22 }
 0x9b0   :  { %2988 = vmatmul.mubr.msk.f32.vlgmr.msra.gmra.mxu1 %vm90_vm0, %v2186_v23 }
 0xa70   :  { %v2989_v28 = vpop.f32.mrf.mxu1 }
 0xa71   :  { %v2274_v29 = vadd.f32 %v2989_v28, %v2510_v27 }
 0xa72   :  { %v2268_v30 = vpop.f32.mrf.mxu1 }
 0xa73   :  { %v2269_v31 = vadd.f32 %v2510_v27, %v2268_v30  ;;  %v2278_v33 = vmax.f32 %v2274_v29, 0.0 }
 0xa75   :  { %v2277_v32 = vmax.f32 %v2269_v31, 0.0 }
 0xa77   :  { %3006 = vmatprep.mubr.msk.f32.mxu0 %vm840_vm1, %v2277_v32 }
 0xa78   :  { %3007 = vmatmul.mubr.msk.f32.vlgmr.msra.gmra.mxu0 %vm840_vm1, %v2278_v33 }
 0xb38   :  { %v3008_v36 = vpop.f32.mrf.mxu0 }
 0xb39   :  { %v2369_v37 = vadd.f32 %v3008_v36, %v2290_v35 }
 0xb3a   :  { %v2363_v38 = vpop.f32.mrf.mxu0 }
 0xb3b   :  { %v2364_v39 = vadd.f32 %v2363_v38, %v2290_v35  ;;  %v2373_v40 = vadd.f32 %v2369_v37, %v2186_v23 }
 0xb3d   :  { %v2377_v41 = vsel %vm90_vm0, %v2373_v40, 0.0  ;;  %v2372_v42 = vadd.f32 %v2364_v39, %v2185_v22 }
 0xb3e   :  { %2378 = vadd.xlane.f32.xlu1 %v2377_v41 }
 0xb3f   :  { %v2374_v43 = vsel %vm90_vm0, %v2372_v42, 0.0 }
 0xb40   :  { %2375 = vadd.xlane.f32.xlu0 %v2374_v43 }
 0xbc7   :  { %v2379_v44 = vpop.xlane.xlu1 %2378 }
 0xbc8   :  { %v2381_v48 = vmul.f32 0.03125, %v2379_v44 }
 0xbc9   :  { %v2376_v51 = vpop.xlane.xlu0 %2375 }
 0xbca   :  { %v2383_v52 = vsub.f32 %v2373_v40, %v2381_v48  ;;  %v2380_v53 = vmul.f32 0.03125, %v2376_v51 }
 0xbcc   :  { %v2382_v3 = vsub.f32 %v2372_v42, %v2380_v53  ;;  %v2385_v7 = vmul.f32 %v2383_v52, %v2383_v52 }
 0xbce   :  { %v2389_v50 = vsel %vm90_vm0, %v2385_v7, 0.0  ;;  %v2384_v54 = vmul.f32 %v2382_v3, %v2382_v3 }
 0xbcf   :  { %2390 = vadd.xlane.f32.xlu1 %v2389_v50 }
 0xbd0   :  { %v2386_v55 = vsel %vm90_vm0, %v2384_v54, 0.0 }
 0xbd1   :  { %2387 = vadd.xlane.f32.xlu0 %v2386_v55 }
 0xc58   :  { %v2391_v56 = vpop.xlane.xlu1 %2390 }
 0xc59   :  { %v2393_v57 = vmul.f32 0.03125, %v2391_v56 }
 0xc5a   :  { %v2388_v58 = vpop.xlane.xlu0 %2387 }
 0xc5b   :  { %v2395_v59 = vadd.f32 1e-05, %v2393_v57  ;;  %v2392_v45 = vmul.f32 0.03125, %v2388_v58 }
 0xc5d   :  { %3084 = vrsqrt.f32 %v2395_v59  ;;  %v2394_v46 = vadd.f32 1e-05, %v2392_v45 }
 0xc5f   :  { %3086 = vrsqrt.f32 %v2394_v46 }
 0xc6a   :  { %v3085_v0 = vpop.eup %3084 }
 0xc6b   :  { %v2399_v4 = vmul.f32 %v3085_v0, %v2383_v52 }
 0xc6c   :  { %v3087_v5 = vpop.eup %3086 }
 0xc6d   :  { %v2398_v8 = vmul.f32 %v3087_v5, %v2382_v3  ;;  %v2405_v9 = vmul.f32 %v2403_v63, %v2399_v4 }
 0xc6f   :  { %v2404_v10 = vmul.f32 %v2403_v63, %v2398_v8  ;;  %v2411_v11 = vadd.f32 %v2409_v1, %v2405_v9 }
 0xc71   :  { %v2410_v12 = vadd.f32 %v2409_v1, %v2404_v10  ;;  %2413 = vst.msk [vmem:[#allocation2 + $0x8] sm:$0xff] %vm90_vm0, %v2411_v11 }
 0xc73   :  { %2412 = vst.msk [vmem:[#allocation2] sm:$0xff] %vm90_vm0, %v2410_v12 }
 0xc74   :  { %3100 = shalt.err (!%p3097_p4)
}
 0xc75   :  { %s3112_s1 = smov 128   ;;  %s3113_s16 = smov 8  }
 0xc76   :  { %2425 = dma.vmem_to_hbm [thread:$0]  %s2420_s15, 256, %s3759_s8, [#allocation3], %s3112_s1, %s3112_s1, %s3113_s16  }
 0xc77   :  { %3109 = dma.done.wait [#allocation3], 256  }
 0xc78   :  { %3110 = vsyncadd [#allocation3], 4294967040 }
 0xc79   :  { %2429 = vsyncpa [#allocation3], 1 }

</bundles_post_ra>
